<compile_context>
chip_gen: v7x
topology: tpu7x:2x2x1
jax: 0.10.0
libtpu: 0.0.40
codegen_flags: <defaults>
</compile_context>

<pallas_src>
import numpy as np
import jax
import jax.numpy as jnp
from jax import lax
from jax.experimental import pallas as pl
from jax.experimental.pallas import tpu as pltpu

START_TAG = "<START>"
STOP_TAG = "<STOP>"
EMO_TO_IX = {"ang": 0, "hap": 1, "neu": 2, "sad": 3, START_TAG: 4, STOP_TAG: 5}
START_IDX = EMO_TO_IX[START_TAG]
STOP_IDX = EMO_TO_IX[STOP_TAG]

BL = 128   # dialogs packed on lanes
SUB = 8    # sublanes per inner sub-tile (one vreg tall)


def _viterbi_kernel(feats_ref, use_ref, intra_ref, inter_ref,
                    score_ref, path_ref, bp_ref):
    """Viterbi recursion + backtrace for one (BSUB, 128) block of dialogs.

    feats_ref : (T, S, BSUB, 128) f32  emission features, tag-major
    use_ref   : (T, BSUB, 128)    f32  1.0 -> transitions_intra, 0.0 -> inter
    intra_ref : (S, S) f32 in SMEM     [next_tag, prev_tag]
    inter_ref : (S, S) f32 in SMEM     [next_tag, prev_tag]
    score_ref : (BSUB, 128) f32        best path score per dialog
    path_ref  : (T, BSUB, 128) i32     decoded tag sequence per dialog
    bp_ref    : (T, S, 8, 128) i32     VMEM backpointer scratch (reused per sub-tile)
    """
    T, S, bsub, bl = feats_ref.shape
    nsub = bsub // SUB

    # Hoist the tiny transition tables out of all loops as traced scalars
    # (SMEM reads + deltas stay on the scalar path; computed once per block).
    inter_s = [[inter_ref[nt, p] for p in range(S)] for nt in range(S)]
    delta_s = [[intra_ref[nt, p] - inter_ref[nt, p] for p in range(S)]
               for nt in range(S)]
    stop_s = [intra_ref[STOP_IDX, t] for t in range(S)]

    def sub_tile(j, carry):
        row = pl.multiple_of(j * SUB, SUB)

        # init_vvars: -10000 everywhere except the START tag.
        fv0 = tuple(
            jnp.full((SUB, bl), 0.0 if t == START_IDX else -10000.0, jnp.float32)
            for t in range(S))

        def fwd_step(i, fv):
            use_f = use_ref[i, pl.ds(row, SUB), :]               # (8,128) in {0,1}
            new_fv = []
            for nt in range(S):
                # Fused running max / argmax over previous tags (first-max
                # tie-break, matching torch/np argmax).  Pure VPU work, no
                # cross-lane ops; transitions blended arithmetically.
                best = fv[0] + (inter_s[nt][0] + use_f * delta_s[nt][0])
                bp = jnp.zeros((SUB, bl), jnp.int32)
                for p in range(1, S):
                    cand = fv[p] + (inter_s[nt][p] + use_f * delta_s[nt][p])
                    take = cand > best
                    best = jnp.where(take, cand, best)
                    bp = jnp.where(take, jnp.int32(p), bp)
                bp_ref[i, nt] = bp
                new_fv.append(best + feats_ref[i, nt, pl.ds(row, SUB), :])
            return tuple(new_fv)

        fv = lax.fori_loop(0, T, fwd_step, fv0)

        # terminal_var = forward_var + transitions_intra[STOP] (always intra).
        best_score = fv[0] + stop_s[0]
        best_tag = jnp.zeros((SUB, bl), jnp.int32)
        for t in range(1, S):
            term = fv[t] + stop_s[t]
            take = term > best_score
            best_score = jnp.where(take, term, best_score)
            best_tag = jnp.where(take, jnp.int32(t), best_tag)

        score_ref[pl.ds(row, SUB), :] = best_score
        path_ref[T - 1, pl.ds(row, SUB), :] = best_tag

        # Backtrace (START popped off; decoded path has length T).
        def bwd_step(k, cur):
            i = T - 1 - k
            prev = bp_ref[i, 0]
            for t in range(1, S):
                prev = jnp.where(cur == t, bp_ref[i, t], prev)
            path_ref[i - 1, pl.ds(row, SUB), :] = prev
            return prev

        lax.fori_loop(0, T - 1, bwd_step, best_tag)
        return carry

    lax.fori_loop(0, nsub, sub_tile, jnp.int32(0))


def _viterbi_pallas(feats_k, use_k, trans_intra, trans_inter):
    """feats_k (G,T,S,BSUB,128) f32, use_k (G,T,BSUB,128) f32 in {0,1}."""
    G, T, S, BSUB, bl = feats_k.shape
    n_dialogs = G * BSUB * bl
    flops_per_dialog = T * S * (6 * S - 2) + (4 * S - 3) + (T - 1) * (2 * S - 1)
    bytes_accessed = 4 * (feats_k.size + use_k.size + 2 * S * S
                          + n_dialogs * (T + 1))

    return pl.pallas_call(
        _viterbi_kernel,
        grid=(G,),
        in_specs=[
            pl.BlockSpec((None, T, S, BSUB, bl), lambda g: (g, 0, 0, 0, 0)),  # feats
            pl.BlockSpec((None, T, BSUB, bl), lambda g: (g, 0, 0, 0)),        # use mask
            pl.BlockSpec(memory_space=pltpu.MemorySpace.SMEM),                # intra (S,S)
            pl.BlockSpec(memory_space=pltpu.MemorySpace.SMEM),                # inter (S,S)
        ],
        out_specs=(
            pl.BlockSpec((None, BSUB, bl), lambda g: (g, 0, 0)),
            pl.BlockSpec((None, T, BSUB, bl), lambda g: (g, 0, 0, 0)),
        ),
        out_shape=(
            jax.ShapeDtypeStruct((G, BSUB, bl), jnp.float32),
            jax.ShapeDtypeStruct((G, T, BSUB, bl), jnp.int32),
        ),
        scratch_shapes=[pltpu.VMEM((T, S, SUB, bl), jnp.int32)],   # backpointers
        compiler_params=pltpu.CompilerParams(
            dimension_semantics=("parallel",)),                     # 2 TCs on v7x
        cost_estimate=pl.CostEstimate(
            flops=int(n_dialogs * flops_per_dialog),
            transcendentals=0,
            bytes_accessed=int(bytes_accessed)),
    )(feats_k, use_k, trans_intra, trans_inter)


def _choose_bsub(batch):
    # Pack up to 32 sublanes per grid step, but keep the grid length >= 2 so
    # both v7x TensorCores receive a block.
    for bsub in (32, 16):
        if batch >= 2 * bsub * BL:
            return bsub
    return SUB


def _pack_batch(x, g, bsub, fill):
    """(B, T) -> (g, T, bsub, 128), padding the batch with `fill`."""
    B, T = x.shape
    Bp = g * bsub * BL
    if Bp != B:
        pad = jnp.full((Bp - B, T), fill, x.dtype)
        x = jnp.concatenate([x, pad], axis=0)
    return x.reshape(g, bsub, BL, T).transpose(0, 3, 1, 2)


@jax.jit
def crf_forward_batch(dialogs, speakers, out_table, trans_intra, trans_inter):
    """Batched CRF.forward: emission features + Viterbi decode.

    dialogs  : (B, T) int32   utterance indices
    speakers : (B, T) int32   speaker id per utterance (stands in for dialog[i][-4])
    out_table: (V, 4) f32     pretrain-model emission lookup table
    trans_*  : (S, S) f32     transition matrices, indexed [next_tag, prev_tag]
    returns (scores (B,) f32, paths (B, T) int32)
    """
    B, T = dialogs.shape
    bsub = _choose_bsub(B)
    G = max(2, pl.cdiv(B, bsub * BL))      # >= 2 blocks for v7x megacore
    Bp = G * bsub * BL

    dlg_k = _pack_batch(dialogs, G, bsub, 0)                    # (G,T,bsub,128)
    spk_k = _pack_batch(speakers, G, bsub, 0)

    # use mask as f32 {0,1}: step 0 or same speaker as previous step -> intra.
    same = spk_k[:, 1:] == spk_k[:, :-1]
    use_k = jnp.concatenate(
        [jnp.ones((G, 1, bsub, BL), jnp.bool_), same], axis=1).astype(jnp.float32)

    # Emission features built directly in the packed (G,T,S,bsub,128) layout.
    # Mirrors CRF._get_pretrain_model_features with out_dict/ix_to_utt replaced
    # by a deterministic synthetic lookup table.
    # TODO(synk): out_dict / ix_to_utt are external resources; synthesized here.
    # TODO(synk): torch builds these feats as float64; kept float32 for TPU.
    emo = out_table.astype(jnp.float32).T[:, dlg_k]             # (4,G,T,bsub,128)
    emo = jnp.moveaxis(emo, 0, 2)                               # (G,T,4,bsub,128)
    t_idx = jnp.arange(T)
    col_start = jnp.where(t_idx == 0, 3.0, -3.0).astype(jnp.float32)
    col_end = jnp.where(t_idx == T - 1, 3.0, -3.0).astype(jnp.float32)
    flags = jnp.stack([col_start, col_end], axis=-1)            # (T,2)
    flags_k = jnp.broadcast_to(flags[None, :, :, None, None], (G, T, 2, bsub, BL))
    feats_k = jnp.concatenate([emo, flags_k], axis=2)           # (G,T,6,bsub,128)

    score_k, path_k = _viterbi_pallas(
        feats_k, use_k,
        trans_intra.astype(jnp.float32), trans_inter.astype(jnp.float32))

    scores = score_k.reshape(Bp)[:B]
    paths = path_k.transpose(0, 2, 3, 1).reshape(Bp, T)[:B]
    return scores, paths


# ------------------------- reference (verification) -------------------------

def _feats_ref_np(dialogs, out_table):
    dialogs = np.asarray(dialogs)
    out_table = np.asarray(out_table, np.float32)
    B, T = dialogs.shape
    feats = np.zeros((B, T, 6), np.float32)
    feats[:, :, :4] = out_table[dialogs]
    feats[:, :, 4] = -3.0
    feats[:, 0, 4] = 3.0
    feats[:, :, 5] = -3.0
    feats[:, -1, 5] = 3.0
    return feats


def _viterbi_ref_np(feats, t_intra, t_inter, use_intra):
    # Vectorized numpy transcription of CRF._viterbi_decode.  Uses the same f32
    # blend order of operations as the kernel (blend == select since use in {0,1}).
    feats = np.asarray(feats, np.float32)
    ti = np.asarray(t_intra, np.float32)
    te = np.asarray(t_inter, np.float32)
    use = np.asarray(use_intra, np.float32)
    delta = (ti - te).astype(np.float32)
    B, T, S = feats.shape
    fv = np.full((B, S), -10000.0, np.float32)
    fv[:, START_IDX] = 0.0
    bps = np.zeros((B, T, S), np.int32)
    for i in range(T):
        tr = (te[None] + use[:, i, None, None] * delta[None]).astype(np.float32)
        scores = (fv[:, None, :] + tr).astype(np.float32)          # (B, next, prev)
        bps[:, i, :] = np.argmax(scores, axis=2).astype(np.int32)
        fv = (np.max(scores, axis=2) + feats[:, i, :]).astype(np.float32)
    terminal = (fv + ti[STOP_IDX][None, :]).astype(np.float32)
    best_tag = np.argmax(terminal, axis=1)
    best_score = terminal[np.arange(B), best_tag].astype(np.float32)
    path = np.zeros((B, T), np.int32)
    path[:, T - 1] = best_tag
    cur = best_tag
    for i in range(T - 1, 0, -1):
        cur = bps[np.arange(B), i, cur]
        path[:, i - 1] = cur
    return best_score, path


if __name__ == "__main__":
    key = jax.random.PRNGKey(0)
    k_inter, k_intra, k_tbl, k_dlg, k_spk = jax.random.split(key, 5)

    vocab_size = 16
    S = len(EMO_TO_IX)     # 6 tags: 4 emotions + START + STOP
    T = 8                  # utterances per dialog
    B = 8192               # dialogs: exactly 2 grid blocks of (32 sublanes x 128 lanes)

    # Parameters (mirrors nn.Parameter(torch.randn(S, S)) + START/STOP masking).
    trans_inter = jax.random.normal(k_inter, (S, S), jnp.float32)
    trans_intra = jax.random.normal(k_intra, (S, S), jnp.float32)
    trans_inter = trans_inter.at[START_IDX, :].set(-10000.0).at[:, STOP_IDX].set(-10000.0)
    trans_intra = trans_intra.at[START_IDX, :].set(-10000.0).at[:, STOP_IDX].set(-10000.0)

    # Synthetic pretrain-model emission table + dialogs + speakers.
    out_table = jax.random.normal(k_tbl, (vocab_size, 4), jnp.float32)
    dialogs = jax.random.randint(k_dlg, (B, T), 0, vocab_size)
    speakers = jax.random.randint(k_spk, (B, T), 0, 2)     # stands in for dialog[i][-4]

    scores, paths = crf_forward_batch(dialogs, speakers, out_table,
                                      trans_intra, trans_inter)
    scores = jax.block_until_ready(scores)
    paths = jax.block_until_ready(paths)

    feats_ref = _feats_ref_np(dialogs, out_table)
    use_ref = np.concatenate(
        [np.ones((B, 1), np.int32),
         (np.asarray(speakers)[:, :-1] == np.asarray(speakers)[:, 1:]).astype(np.int32)],
        axis=1)
    ref_scores, ref_paths = _viterbi_ref_np(feats_ref, trans_intra, trans_inter, use_ref)

    assert np.allclose(np.asarray(scores), ref_scores, atol=1e-3), (
        float(np.max(np.abs(np.asarray(scores) - ref_scores))))
    assert np.array_equal(np.asarray(paths), ref_paths), (
        int(np.sum(np.asarray(paths) != ref_paths)))

    print("KERNEL_OK")
</pallas_src>

<mosaic_0001>
module attributes {stable_mosaic.version = 11 : i64} {
  func.func @_viterbi_kernel(%arg0: i32, %arg1: memref<1x8x6x32x128xf32, #tpu.memory_space<vmem>>, %arg2: memref<1x8x32x128xf32, #tpu.memory_space<vmem>>, %arg3: memref<6x6xf32, #tpu.memory_space<smem>>, %arg4: memref<6x6xf32, #tpu.memory_space<smem>>, %arg5: memref<1x32x128xf32, #tpu.memory_space<vmem>>, %arg6: memref<1x8x32x128xi32, #tpu.memory_space<vmem>>, %arg7: memref<8x6x8x128xi32, #tpu.memory_space<vmem>>) attributes {dimension_semantics = [#tpu.dimension_semantics<parallel>], iteration_bounds = array<i64: 2>, scalar_prefetch = 0 : i64, scratch_operands = 1 : i64, tpu.core_type = #tpu.core_type<tc>, window_params = [{transform_indices = @transform_0, window_bounds = array<i64: 1, 8, 6, 32, 128>}, {transform_indices = @transform_1, window_bounds = array<i64: 1, 8, 32, 128>}, {transform_indices = @transform_2, window_bounds = array<i64: 6, 6>}, {transform_indices = @transform_3, window_bounds = array<i64: 6, 6>}, {transform_indices = @transform_4, window_bounds = array<i64: 1, 32, 128>}, {transform_indices = @transform_5, window_bounds = array<i64: 1, 8, 32, 128>}]} {
    %c0 = arith.constant 0 : index
    %c0_0 = arith.constant 0 : index
    %0 = memref.load %arg4[%c0, %c0_0] : memref<6x6xf32, #tpu.memory_space<smem>>
    %c0_1 = arith.constant 0 : index
    %c1 = arith.constant 1 : index
    %1 = memref.load %arg4[%c0_1, %c1] : memref<6x6xf32, #tpu.memory_space<smem>>
    %c0_2 = arith.constant 0 : index
    %c2 = arith.constant 2 : index
    %2 = memref.load %arg4[%c0_2, %c2] : memref<6x6xf32, #tpu.memory_space<smem>>
    %c0_3 = arith.constant 0 : index
    %c3 = arith.constant 3 : index
    %3 = memref.load %arg4[%c0_3, %c3] : memref<6x6xf32, #tpu.memory_space<smem>>
    %c0_4 = arith.constant 0 : index
    %c4 = arith.constant 4 : index
    %4 = memref.load %arg4[%c0_4, %c4] : memref<6x6xf32, #tpu.memory_space<smem>>
    %c0_5 = arith.constant 0 : index
    %c5 = arith.constant 5 : index
    %5 = memref.load %arg4[%c0_5, %c5] : memref<6x6xf32, #tpu.memory_space<smem>>
    %c1_6 = arith.constant 1 : index
    %c0_7 = arith.constant 0 : index
    %6 = memref.load %arg4[%c1_6, %c0_7] : memref<6x6xf32, #tpu.memory_space<smem>>
    %c1_8 = arith.constant 1 : index
    %c1_9 = arith.constant 1 : index
    %7 = memref.load %arg4[%c1_8, %c1_9] : memref<6x6xf32, #tpu.memory_space<smem>>
    %c1_10 = arith.constant 1 : index
    %c2_11 = arith.constant 2 : index
    %8 = memref.load %arg4[%c1_10, %c2_11] : memref<6x6xf32, #tpu.memory_space<smem>>
    %c1_12 = arith.constant 1 : index
    %c3_13 = arith.constant 3 : index
    %9 = memref.load %arg4[%c1_12, %c3_13] : memref<6x6xf32, #tpu.memory_space<smem>>
    %c1_14 = arith.constant 1 : index
    %c4_15 = arith.constant 4 : index
    %10 = memref.load %arg4[%c1_14, %c4_15] : memref<6x6xf32, #tpu.memory_space<smem>>
    %c1_16 = arith.constant 1 : index
    %c5_17 = arith.constant 5 : index
    %11 = memref.load %arg4[%c1_16, %c5_17] : memref<6x6xf32, #tpu.memory_space<smem>>
    %c2_18 = arith.constant 2 : index
    %c0_19 = arith.constant 0 : index
    %12 = memref.load %arg4[%c2_18, %c0_19] : memref<6x6xf32, #tpu.memory_space<smem>>
    %c2_20 = arith.constant 2 : index
    %c1_21 = arith.constant 1 : index
    %13 = memref.load %arg4[%c2_20, %c1_21] : memref<6x6xf32, #tpu.memory_space<smem>>
    %c2_22 = arith.constant 2 : index
    %c2_23 = arith.constant 2 : index
    %14 = memref.load %arg4[%c2_22, %c2_23] : memref<6x6xf32, #tpu.memory_space<smem>>
    %c2_24 = arith.constant 2 : index
    %c3_25 = arith.constant 3 : index
    %15 = memref.load %arg4[%c2_24, %c3_25] : memref<6x6xf32, #tpu.memory_space<smem>>
    %c2_26 = arith.constant 2 : index
    %c4_27 = arith.constant 4 : index
    %16 = memref.load %arg4[%c2_26, %c4_27] : memref<6x6xf32, #tpu.memory_space<smem>>
    %c2_28 = arith.constant 2 : index
    %c5_29 = arith.constant 5 : index
    %17 = memref.load %arg4[%c2_28, %c5_29] : memref<6x6xf32, #tpu.memory_space<smem>>
    %c3_30 = arith.constant 3 : index
    %c0_31 = arith.constant 0 : index
    %18 = memref.load %arg4[%c3_30, %c0_31] : memref<6x6xf32, #tpu.memory_space<smem>>
    %c3_32 = arith.constant 3 : index
    %c1_33 = arith.constant 1 : index
    %19 = memref.load %arg4[%c3_32, %c1_33] : memref<6x6xf32, #tpu.memory_space<smem>>
    %c3_34 = arith.constant 3 : index
    %c2_35 = arith.constant 2 : index
    %20 = memref.load %arg4[%c3_34, %c2_35] : memref<6x6xf32, #tpu.memory_space<smem>>
    %c3_36 = arith.constant 3 : index
    %c3_37 = arith.constant 3 : index
    %21 = memref.load %arg4[%c3_36, %c3_37] : memref<6x6xf32, #tpu.memory_space<smem>>
    %c3_38 = arith.constant 3 : index
    %c4_39 = arith.constant 4 : index
    %22 = memref.load %arg4[%c3_38, %c4_39] : memref<6x6xf32, #tpu.memory_space<smem>>
    %c3_40 = arith.constant 3 : index
    %c5_41 = arith.constant 5 : index
    %23 = memref.load %arg4[%c3_40, %c5_41] : memref<6x6xf32, #tpu.memory_space<smem>>
    %c4_42 = arith.constant 4 : index
    %c0_43 = arith.constant 0 : index
    %24 = memref.load %arg4[%c4_42, %c0_43] : memref<6x6xf32, #tpu.memory_space<smem>>
    %c4_44 = arith.constant 4 : index
    %c1_45 = arith.constant 1 : index
    %25 = memref.load %arg4[%c4_44, %c1_45] : memref<6x6xf32, #tpu.memory_space<smem>>
    %c4_46 = arith.constant 4 : index
    %c2_47 = arith.constant 2 : index
    %26 = memref.load %arg4[%c4_46, %c2_47] : memref<6x6xf32, #tpu.memory_space<smem>>
    %c4_48 = arith.constant 4 : index
    %c3_49 = arith.constant 3 : index
    %27 = memref.load %arg4[%c4_48, %c3_49] : memref<6x6xf32, #tpu.memory_space<smem>>
    %c4_50 = arith.constant 4 : index
    %c4_51 = arith.constant 4 : index
    %28 = memref.load %arg4[%c4_50, %c4_51] : memref<6x6xf32, #tpu.memory_space<smem>>
    %c4_52 = arith.constant 4 : index
    %c5_53 = arith.constant 5 : index
    %29 = memref.load %arg4[%c4_52, %c5_53] : memref<6x6xf32, #tpu.memory_space<smem>>
    %c5_54 = arith.constant 5 : index
    %c0_55 = arith.constant 0 : index
    %30 = memref.load %arg4[%c5_54, %c0_55] : memref<6x6xf32, #tpu.memory_space<smem>>
    %c5_56 = arith.constant 5 : index
    %c1_57 = arith.constant 1 : index
    %31 = memref.load %arg4[%c5_56, %c1_57] : memref<6x6xf32, #tpu.memory_space<smem>>
    %c5_58 = arith.constant 5 : index
    %c2_59 = arith.constant 2 : index
    %32 = memref.load %arg4[%c5_58, %c2_59] : memref<6x6xf32, #tpu.memory_space<smem>>
    %c5_60 = arith.constant 5 : index
    %c3_61 = arith.constant 3 : index
    %33 = memref.load %arg4[%c5_60, %c3_61] : memref<6x6xf32, #tpu.memory_space<smem>>
    %c5_62 = arith.constant 5 : index
    %c4_63 = arith.constant 4 : index
    %34 = memref.load %arg4[%c5_62, %c4_63] : memref<6x6xf32, #tpu.memory_space<smem>>
    %c5_64 = arith.constant 5 : index
    %c5_65 = arith.constant 5 : index
    %35 = memref.load %arg4[%c5_64, %c5_65] : memref<6x6xf32, #tpu.memory_space<smem>>
    %c0_66 = arith.constant 0 : index
    %c0_67 = arith.constant 0 : index
    %36 = memref.load %arg3[%c0_66, %c0_67] : memref<6x6xf32, #tpu.memory_space<smem>>
    %c0_68 = arith.constant 0 : index
    %c0_69 = arith.constant 0 : index
    %37 = memref.load %arg4[%c0_68, %c0_69] : memref<6x6xf32, #tpu.memory_space<smem>>
    %38 = arith.subf %36, %37 : f32
    %c0_70 = arith.constant 0 : index
    %c1_71 = arith.constant 1 : index
    %39 = memref.load %arg3[%c0_70, %c1_71] : memref<6x6xf32, #tpu.memory_space<smem>>
    %c0_72 = arith.constant 0 : index
    %c1_73 = arith.constant 1 : index
    %40 = memref.load %arg4[%c0_72, %c1_73] : memref<6x6xf32, #tpu.memory_space<smem>>
    %41 = arith.subf %39, %40 : f32
    %c0_74 = arith.constant 0 : index
    %c2_75 = arith.constant 2 : index
    %42 = memref.load %arg3[%c0_74, %c2_75] : memref<6x6xf32, #tpu.memory_space<smem>>
    %c0_76 = arith.constant 0 : index
    %c2_77 = arith.constant 2 : index
    %43 = memref.load %arg4[%c0_76, %c2_77] : memref<6x6xf32, #tpu.memory_space<smem>>
    %44 = arith.subf %42, %43 : f32
    %c0_78 = arith.constant 0 : index
    %c3_79 = arith.constant 3 : index
    %45 = memref.load %arg3[%c0_78, %c3_79] : memref<6x6xf32, #tpu.memory_space<smem>>
    %c0_80 = arith.constant 0 : index
    %c3_81 = arith.constant 3 : index
    %46 = memref.load %arg4[%c0_80, %c3_81] : memref<6x6xf32, #tpu.memory_space<smem>>
    %47 = arith.subf %45, %46 : f32
    %c0_82 = arith.constant 0 : index
    %c4_83 = arith.constant 4 : index
    %48 = memref.load %arg3[%c0_82, %c4_83] : memref<6x6xf32, #tpu.memory_space<smem>>
    %c0_84 = arith.constant 0 : index
    %c4_85 = arith.constant 4 : index
    %49 = memref.load %arg4[%c0_84, %c4_85] : memref<6x6xf32, #tpu.memory_space<smem>>
    %50 = arith.subf %48, %49 : f32
    %c0_86 = arith.constant 0 : index
    %c5_87 = arith.constant 5 : index
    %51 = memref.load %arg3[%c0_86, %c5_87] : memref<6x6xf32, #tpu.memory_space<smem>>
    %c0_88 = arith.constant 0 : index
    %c5_89 = arith.constant 5 : index
    %52 = memref.load %arg4[%c0_88, %c5_89] : memref<6x6xf32, #tpu.memory_space<smem>>
    %53 = arith.subf %51, %52 : f32
    %c1_90 = arith.constant 1 : index
    %c0_91 = arith.constant 0 : index
    %54 = memref.load %arg3[%c1_90, %c0_91] : memref<6x6xf32, #tpu.memory_space<smem>>
    %c1_92 = arith.constant 1 : index
    %c0_93 = arith.constant 0 : index
    %55 = memref.load %arg4[%c1_92, %c0_93] : memref<6x6xf32, #tpu.memory_space<smem>>
    %56 = arith.subf %54, %55 : f32
    %c1_94 = arith.constant 1 : index
    %c1_95 = arith.constant 1 : index
    %57 = memref.load %arg3[%c1_94, %c1_95] : memref<6x6xf32, #tpu.memory_space<smem>>
    %c1_96 = arith.constant 1 : index
    %c1_97 = arith.constant 1 : index
    %58 = memref.load %arg4[%c1_96, %c1_97] : memref<6x6xf32, #tpu.memory_space<smem>>
    %59 = arith.subf %57, %58 : f32
    %c1_98 = arith.constant 1 : index
    %c2_99 = arith.constant 2 : index
    %60 = memref.load %arg3[%c1_98, %c2_99] : memref<6x6xf32, #tpu.memory_space<smem>>
    %c1_100 = arith.constant 1 : index
    %c2_101 = arith.constant 2 : index
    %61 = memref.load %arg4[%c1_100, %c2_101] : memref<6x6xf32, #tpu.memory_space<smem>>
    %62 = arith.subf %60, %61 : f32
    %c1_102 = arith.constant 1 : index
    %c3_103 = arith.constant 3 : index
    %63 = memref.load %arg3[%c1_102, %c3_103] : memref<6x6xf32, #tpu.memory_space<smem>>
    %c1_104 = arith.constant 1 : index
    %c3_105 = arith.constant 3 : index
    %64 = memref.load %arg4[%c1_104, %c3_105] : memref<6x6xf32, #tpu.memory_space<smem>>
    %65 = arith.subf %63, %64 : f32
    %c1_106 = arith.constant 1 : index
    %c4_107 = arith.constant 4 : index
    %66 = memref.load %arg3[%c1_106, %c4_107] : memref<6x6xf32, #tpu.memory_space<smem>>
    %c1_108 = arith.constant 1 : index
    %c4_109 = arith.constant 4 : index
    %67 = memref.load %arg4[%c1_108, %c4_109] : memref<6x6xf32, #tpu.memory_space<smem>>
    %68 = arith.subf %66, %67 : f32
    %c1_110 = arith.constant 1 : index
    %c5_111 = arith.constant 5 : index
    %69 = memref.load %arg3[%c1_110, %c5_111] : memref<6x6xf32, #tpu.memory_space<smem>>
    %c1_112 = arith.constant 1 : index
    %c5_113 = arith.constant 5 : index
    %70 = memref.load %arg4[%c1_112, %c5_113] : memref<6x6xf32, #tpu.memory_space<smem>>
    %71 = arith.subf %69, %70 : f32
    %c2_114 = arith.constant 2 : index
    %c0_115 = arith.constant 0 : index
    %72 = memref.load %arg3[%c2_114, %c0_115] : memref<6x6xf32, #tpu.memory_space<smem>>
    %c2_116 = arith.constant 2 : index
    %c0_117 = arith.constant 0 : index
    %73 = memref.load %arg4[%c2_116, %c0_117] : memref<6x6xf32, #tpu.memory_space<smem>>
    %74 = arith.subf %72, %73 : f32
    %c2_118 = arith.constant 2 : index
    %c1_119 = arith.constant 1 : index
    %75 = memref.load %arg3[%c2_118, %c1_119] : memref<6x6xf32, #tpu.memory_space<smem>>
    %c2_120 = arith.constant 2 : index
    %c1_121 = arith.constant 1 : index
    %76 = memref.load %arg4[%c2_120, %c1_121] : memref<6x6xf32, #tpu.memory_space<smem>>
    %77 = arith.subf %75, %76 : f32
    %c2_122 = arith.constant 2 : index
    %c2_123 = arith.constant 2 : index
    %78 = memref.load %arg3[%c2_122, %c2_123] : memref<6x6xf32, #tpu.memory_space<smem>>
    %c2_124 = arith.constant 2 : index
    %c2_125 = arith.constant 2 : index
    %79 = memref.load %arg4[%c2_124, %c2_125] : memref<6x6xf32, #tpu.memory_space<smem>>
    %80 = arith.subf %78, %79 : f32
    %c2_126 = arith.constant 2 : index
    %c3_127 = arith.constant 3 : index
    %81 = memref.load %arg3[%c2_126, %c3_127] : memref<6x6xf32, #tpu.memory_space<smem>>
    %c2_128 = arith.constant 2 : index
    %c3_129 = arith.constant 3 : index
    %82 = memref.load %arg4[%c2_128, %c3_129] : memref<6x6xf32, #tpu.memory_space<smem>>
    %83 = arith.subf %81, %82 : f32
    %c2_130 = arith.constant 2 : index
    %c4_131 = arith.constant 4 : index
    %84 = memref.load %arg3[%c2_130, %c4_131] : memref<6x6xf32, #tpu.memory_space<smem>>
    %c2_132 = arith.constant 2 : index
    %c4_133 = arith.constant 4 : index
    %85 = memref.load %arg4[%c2_132, %c4_133] : memref<6x6xf32, #tpu.memory_space<smem>>
    %86 = arith.subf %84, %85 : f32
    %c2_134 = arith.constant 2 : index
    %c5_135 = arith.constant 5 : index
    %87 = memref.load %arg3[%c2_134, %c5_135] : memref<6x6xf32, #tpu.memory_space<smem>>
    %c2_136 = arith.constant 2 : index
    %c5_137 = arith.constant 5 : index
    %88 = memref.load %arg4[%c2_136, %c5_137] : memref<6x6xf32, #tpu.memory_space<smem>>
    %89 = arith.subf %87, %88 : f32
    %c3_138 = arith.constant 3 : index
    %c0_139 = arith.constant 0 : index
    %90 = memref.load %arg3[%c3_138, %c0_139] : memref<6x6xf32, #tpu.memory_space<smem>>
    %c3_140 = arith.constant 3 : index
    %c0_141 = arith.constant 0 : index
    %91 = memref.load %arg4[%c3_140, %c0_141] : memref<6x6xf32, #tpu.memory_space<smem>>
    %92 = arith.subf %90, %91 : f32
    %c3_142 = arith.constant 3 : index
    %c1_143 = arith.constant 1 : index
    %93 = memref.load %arg3[%c3_142, %c1_143] : memref<6x6xf32, #tpu.memory_space<smem>>
    %c3_144 = arith.constant 3 : index
    %c1_145 = arith.constant 1 : index
    %94 = memref.load %arg4[%c3_144, %c1_145] : memref<6x6xf32, #tpu.memory_space<smem>>
    %95 = arith.subf %93, %94 : f32
    %c3_146 = arith.constant 3 : index
    %c2_147 = arith.constant 2 : index
    %96 = memref.load %arg3[%c3_146, %c2_147] : memref<6x6xf32, #tpu.memory_space<smem>>
    %c3_148 = arith.constant 3 : index
    %c2_149 = arith.constant 2 : index
    %97 = memref.load %arg4[%c3_148, %c2_149] : memref<6x6xf32, #tpu.memory_space<smem>>
    %98 = arith.subf %96, %97 : f32
    %c3_150 = arith.constant 3 : index
    %c3_151 = arith.constant 3 : index
    %99 = memref.load %arg3[%c3_150, %c3_151] : memref<6x6xf32, #tpu.memory_space<smem>>
    %c3_152 = arith.constant 3 : index
    %c3_153 = arith.constant 3 : index
    %100 = memref.load %arg4[%c3_152, %c3_153] : memref<6x6xf32, #tpu.memory_space<smem>>
    %101 = arith.subf %99, %100 : f32
    %c3_154 = arith.constant 3 : index
    %c4_155 = arith.constant 4 : index
    %102 = memref.load %arg3[%c3_154, %c4_155] : memref<6x6xf32, #tpu.memory_space<smem>>
    %c3_156 = arith.constant 3 : index
    %c4_157 = arith.constant 4 : index
    %103 = memref.load %arg4[%c3_156, %c4_157] : memref<6x6xf32, #tpu.memory_space<smem>>
    %104 = arith.subf %102, %103 : f32
    %c3_158 = arith.constant 3 : index
    %c5_159 = arith.constant 5 : index
    %105 = memref.load %arg3[%c3_158, %c5_159] : memref<6x6xf32, #tpu.memory_space<smem>>
    %c3_160 = arith.constant 3 : index
    %c5_161 = arith.constant 5 : index
    %106 = memref.load %arg4[%c3_160, %c5_161] : memref<6x6xf32, #tpu.memory_space<smem>>
    %107 = arith.subf %105, %106 : f32
    %c4_162 = arith.constant 4 : index
    %c0_163 = arith.constant 0 : index
    %108 = memref.load %arg3[%c4_162, %c0_163] : memref<6x6xf32, #tpu.memory_space<smem>>
    %c4_164 = arith.constant 4 : index
    %c0_165 = arith.constant 0 : index
    %109 = memref.load %arg4[%c4_164, %c0_165] : memref<6x6xf32, #tpu.memory_space<smem>>
    %110 = arith.subf %108, %109 : f32
    %c4_166 = arith.constant 4 : index
    %c1_167 = arith.constant 1 : index
    %111 = memref.load %arg3[%c4_166, %c1_167] : memref<6x6xf32, #tpu.memory_space<smem>>
    %c4_168 = arith.constant 4 : index
    %c1_169 = arith.constant 1 : index
    %112 = memref.load %arg4[%c4_168, %c1_169] : memref<6x6xf32, #tpu.memory_space<smem>>
    %113 = arith.subf %111, %112 : f32
    %c4_170 = arith.constant 4 : index
    %c2_171 = arith.constant 2 : index
    %114 = memref.load %arg3[%c4_170, %c2_171] : memref<6x6xf32, #tpu.memory_space<smem>>
    %c4_172 = arith.constant 4 : index
    %c2_173 = arith.constant 2 : index
    %115 = memref.load %arg4[%c4_172, %c2_173] : memref<6x6xf32, #tpu.memory_space<smem>>
    %116 = arith.subf %114, %115 : f32
    %c4_174 = arith.constant 4 : index
    %c3_175 = arith.constant 3 : index
    %117 = memref.load %arg3[%c4_174, %c3_175] : memref<6x6xf32, #tpu.memory_space<smem>>
    %c4_176 = arith.constant 4 : index
    %c3_177 = arith.constant 3 : index
    %118 = memref.load %arg4[%c4_176, %c3_177] : memref<6x6xf32, #tpu.memory_space<smem>>
    %119 = arith.subf %117, %118 : f32
    %c4_178 = arith.constant 4 : index
    %c4_179 = arith.constant 4 : index
    %120 = memref.load %arg3[%c4_178, %c4_179] : memref<6x6xf32, #tpu.memory_space<smem>>
    %c4_180 = arith.constant 4 : index
    %c4_181 = arith.constant 4 : index
    %121 = memref.load %arg4[%c4_180, %c4_181] : memref<6x6xf32, #tpu.memory_space<smem>>
    %122 = arith.subf %120, %121 : f32
    %c4_182 = arith.constant 4 : index
    %c5_183 = arith.constant 5 : index
    %123 = memref.load %arg3[%c4_182, %c5_183] : memref<6x6xf32, #tpu.memory_space<smem>>
    %c4_184 = arith.constant 4 : index
    %c5_185 = arith.constant 5 : index
    %124 = memref.load %arg4[%c4_184, %c5_185] : memref<6x6xf32, #tpu.memory_space<smem>>
    %125 = arith.subf %123, %124 : f32
    %c5_186 = arith.constant 5 : index
    %c0_187 = arith.constant 0 : index
    %126 = memref.load %arg3[%c5_186, %c0_187] : memref<6x6xf32, #tpu.memory_space<smem>>
    %c5_188 = arith.constant 5 : index
    %c0_189 = arith.constant 0 : index
    %127 = memref.load %arg4[%c5_188, %c0_189] : memref<6x6xf32, #tpu.memory_space<smem>>
    %128 = arith.subf %126, %127 : f32
    %c5_190 = arith.constant 5 : index
    %c1_191 = arith.constant 1 : index
    %129 = memref.load %arg3[%c5_190, %c1_191] : memref<6x6xf32, #tpu.memory_space<smem>>
    %c5_192 = arith.constant 5 : index
    %c1_193 = arith.constant 1 : index
    %130 = memref.load %arg4[%c5_192, %c1_193] : memref<6x6xf32, #tpu.memory_space<smem>>
    %131 = arith.subf %129, %130 : f32
    %c5_194 = arith.constant 5 : index
    %c2_195 = arith.constant 2 : index
    %132 = memref.load %arg3[%c5_194, %c2_195] : memref<6x6xf32, #tpu.memory_space<smem>>
    %c5_196 = arith.constant 5 : index
    %c2_197 = arith.constant 2 : index
    %133 = memref.load %arg4[%c5_196, %c2_197] : memref<6x6xf32, #tpu.memory_space<smem>>
    %134 = arith.subf %132, %133 : f32
    %c5_198 = arith.constant 5 : index
    %c3_199 = arith.constant 3 : index
    %135 = memref.load %arg3[%c5_198, %c3_199] : memref<6x6xf32, #tpu.memory_space<smem>>
    %c5_200 = arith.constant 5 : index
    %c3_201 = arith.constant 3 : index
    %136 = memref.load %arg4[%c5_200, %c3_201] : memref<6x6xf32, #tpu.memory_space<smem>>
    %137 = arith.subf %135, %136 : f32
    %c5_202 = arith.constant 5 : index
    %c4_203 = arith.constant 4 : index
    %138 = memref.load %arg3[%c5_202, %c4_203] : memref<6x6xf32, #tpu.memory_space<smem>>
    %c5_204 = arith.constant 5 : index
    %c4_205 = arith.constant 4 : index
    %139 = memref.load %arg4[%c5_204, %c4_205] : memref<6x6xf32, #tpu.memory_space<smem>>
    %140 = arith.subf %138, %139 : f32
    %c5_206 = arith.constant 5 : index
    %c5_207 = arith.constant 5 : index
    %141 = memref.load %arg3[%c5_206, %c5_207] : memref<6x6xf32, #tpu.memory_space<smem>>
    %c5_208 = arith.constant 5 : index
    %c5_209 = arith.constant 5 : index
    %142 = memref.load %arg4[%c5_208, %c5_209] : memref<6x6xf32, #tpu.memory_space<smem>>
    %143 = arith.subf %141, %142 : f32
    %c5_210 = arith.constant 5 : index
    %c0_211 = arith.constant 0 : index
    %144 = memref.load %arg3[%c5_210, %c0_211] : memref<6x6xf32, #tpu.memory_space<smem>>
    %c5_212 = arith.constant 5 : index
    %c1_213 = arith.constant 1 : index
    %145 = memref.load %arg3[%c5_212, %c1_213] : memref<6x6xf32, #tpu.memory_space<smem>>
    %c5_214 = arith.constant 5 : index
    %c2_215 = arith.constant 2 : index
    %146 = memref.load %arg3[%c5_214, %c2_215] : memref<6x6xf32, #tpu.memory_space<smem>>
    %c5_216 = arith.constant 5 : index
    %c3_217 = arith.constant 3 : index
    %147 = memref.load %arg3[%c5_216, %c3_217] : memref<6x6xf32, #tpu.memory_space<smem>>
    %c5_218 = arith.constant 5 : index
    %c4_219 = arith.constant 4 : index
    %148 = memref.load %arg3[%c5_218, %c4_219] : memref<6x6xf32, #tpu.memory_space<smem>>
    %c5_220 = arith.constant 5 : index
    %c5_221 = arith.constant 5 : index
    %149 = memref.load %arg3[%c5_220, %c5_221] : memref<6x6xf32, #tpu.memory_space<smem>>
    %c0_i32 = arith.constant 0 : i32
    %c4_i32 = arith.constant 4 : i32
    %150 = arith.addi %c0_i32, %c4_i32 : i32
    %c1_i32 = arith.constant 1 : i32
    scf.for %arg8 = %c0_i32 to %150 step %c1_i32  : i32 {
      %c8_i32 = arith.constant 8 : i32
      %151 = arith.muli %arg8, %c8_i32 : i32
      %152 = tpu.assume_multiple %151, 8 : i32
      %cst = arith.constant -1.000000e+04 : f32
      %153 = vector.broadcast %cst : f32 to vector<8x128xf32>
      %cst_223 = arith.constant -1.000000e+04 : f32
      %154 = vector.broadcast %cst_223 : f32 to vector<8x128xf32>
      %cst_224 = arith.constant -1.000000e+04 : f32
      %155 = vector.broadcast %cst_224 : f32 to vector<8x128xf32>
      %cst_225 = arith.constant -1.000000e+04 : f32
      %156 = vector.broadcast %cst_225 : f32 to vector<8x128xf32>
      %cst_226 = arith.constant 0.000000e+00 : f32
      %157 = vector.broadcast %cst_226 : f32 to vector<8x128xf32>
      %cst_227 = arith.constant -1.000000e+04 : f32
      %158 = vector.broadcast %cst_227 : f32 to vector<8x128xf32>
      %c0_i32_228 = arith.constant 0 : i32
      %c8_i32_229 = arith.constant 8 : i32
      %159 = arith.addi %c0_i32_228, %c8_i32_229 : i32
      %c1_i32_230 = arith.constant 1 : i32
      %160:6 = scf.for %arg9 = %c0_i32_228 to %159 step %c1_i32_230 iter_args(%arg10 = %153, %arg11 = %154, %arg12 = %155, %arg13 = %156, %arg14 = %157, %arg15 = %158) -> (vector<8x128xf32>, vector<8x128xf32>, vector<8x128xf32>, vector<8x128xf32>, vector<8x128xf32>, vector<8x128xf32>)  : i32 {
        %c0_242 = arith.constant 0 : index
        %204 = arith.index_cast %arg9 : i32 to index
        %205 = arith.index_cast %152 : i32 to index
        %c0_243 = arith.constant 0 : index
        %206 = vector.load %arg2[%c0_242, %204, %205, %c0_243] : memref<1x8x32x128xf32, #tpu.memory_space<vmem>>, vector<1x1x8x128xf32>
        %207 = vector.shape_cast %206 : vector<1x1x8x128xf32> to vector<8x128xf32>
        %208 = vector.broadcast %38 : f32 to vector<8x128xf32>
        %209 = arith.mulf %207, %208 : vector<8x128xf32>
        %210 = vector.broadcast %0 : f32 to vector<8x128xf32>
        %211 = arith.addf %210, %209 : vector<8x128xf32>
        %212 = arith.addf %arg10, %211 : vector<8x128xf32>
        %c0_i32_244 = arith.constant 0 : i32
        %213 = vector.broadcast %c0_i32_244 : i32 to vector<8x128xi32>
        %214 = vector.broadcast %41 : f32 to vector<8x128xf32>
        %215 = arith.mulf %207, %214 : vector<8x128xf32>
        %216 = vector.broadcast %1 : f32 to vector<8x128xf32>
        %217 = arith.addf %216, %215 : vector<8x128xf32>
        %218 = arith.addf %arg11, %217 : vector<8x128xf32>
        %219 = arith.cmpf ogt, %218, %212 : vector<8x128xf32>
        %220 = arith.select %219, %218, %212 : vector<8x128xi1>, vector<8x128xf32>
        %c1_i32_245 = arith.constant 1 : i32
        %221 = vector.broadcast %c1_i32_245 : i32 to vector<8x128xi32>
        %222 = arith.select %219, %221, %213 : vector<8x128xi1>, vector<8x128xi32>
        %223 = vector.broadcast %44 : f32 to vector<8x128xf32>
        %224 = arith.mulf %207, %223 : vector<8x128xf32>
        %225 = vector.broadcast %2 : f32 to vector<8x128xf32>
        %226 = arith.addf %225, %224 : vector<8x128xf32>
        %227 = arith.addf %arg12, %226 : vector<8x128xf32>
        %228 = arith.cmpf ogt, %227, %220 : vector<8x128xf32>
        %229 = arith.select %228, %227, %220 : vector<8x128xi1>, vector<8x128xf32>
        %c2_i32_246 = arith.constant 2 : i32
        %230 = vector.broadcast %c2_i32_246 : i32 to vector<8x128xi32>
        %231 = arith.select %228, %230, %222 : vector<8x128xi1>, vector<8x128xi32>
        %232 = vector.broadcast %47 : f32 to vector<8x128xf32>
        %233 = arith.mulf %207, %232 : vector<8x128xf32>
        %234 = vector.broadcast %3 : f32 to vector<8x128xf32>
        %235 = arith.addf %234, %233 : vector<8x128xf32>
        %236 = arith.addf %arg13, %235 : vector<8x128xf32>
        %237 = arith.cmpf ogt, %236, %229 : vector<8x128xf32>
        %238 = arith.select %237, %236, %229 : vector<8x128xi1>, vector<8x128xf32>
        %c3_i32_247 = arith.constant 3 : i32
        %239 = vector.broadcast %c3_i32_247 : i32 to vector<8x128xi32>
        %240 = arith.select %237, %239, %231 : vector<8x128xi1>, vector<8x128xi32>
        %241 = vector.broadcast %50 : f32 to vector<8x128xf32>
        %242 = arith.mulf %207, %241 : vector<8x128xf32>
        %243 = vector.broadcast %4 : f32 to vector<8x128xf32>
        %244 = arith.addf %243, %242 : vector<8x128xf32>
        %245 = arith.addf %arg14, %244 : vector<8x128xf32>
        %246 = arith.cmpf ogt, %245, %238 : vector<8x128xf32>
        %247 = arith.select %246, %245, %238 : vector<8x128xi1>, vector<8x128xf32>
        %c4_i32_248 = arith.constant 4 : i32
        %248 = vector.broadcast %c4_i32_248 : i32 to vector<8x128xi32>
        %249 = arith.select %246, %248, %240 : vector<8x128xi1>, vector<8x128xi32>
        %250 = vector.broadcast %53 : f32 to vector<8x128xf32>
        %251 = arith.mulf %207, %250 : vector<8x128xf32>
        %252 = vector.broadcast %5 : f32 to vector<8x128xf32>
        %253 = arith.addf %252, %251 : vector<8x128xf32>
        %254 = arith.addf %arg15, %253 : vector<8x128xf32>
        %255 = arith.cmpf ogt, %254, %247 : vector<8x128xf32>
        %256 = arith.select %255, %254, %247 : vector<8x128xi1>, vector<8x128xf32>
        %c5_i32_249 = arith.constant 5 : i32
        %257 = vector.broadcast %c5_i32_249 : i32 to vector<8x128xi32>
        %258 = arith.select %255, %257, %249 : vector<8x128xi1>, vector<8x128xi32>
        %259 = arith.index_cast %arg9 : i32 to index
        %c0_250 = arith.constant 0 : index
        %c0_251 = arith.constant 0 : index
        %c0_252 = arith.constant 0 : index
        %260 = vector.load %arg7[%259, %c0_250, %c0_251, %c0_252] : memref<8x6x8x128xi32, #tpu.memory_space<vmem>>, vector<1x1x8x128xi32>
        %261 = vector.shape_cast %260 : vector<1x1x8x128xi32> to vector<8x128xi32>
        %262 = vector.shape_cast %258 : vector<8x128xi32> to vector<1x1x8x128xi32>
        tpu.vector_store %arg7[%259, %c0_250, %c0_251, %c0_252], %262 {strides = array<i32>} : memref<8x6x8x128xi32, #tpu.memory_space<vmem>>, vector<1x1x8x128xi32>,
        %c0_253 = arith.constant 0 : index
        %263 = arith.index_cast %arg9 : i32 to index
        %c0_254 = arith.constant 0 : index
        %264 = arith.index_cast %152 : i32 to index
        %c0_255 = arith.constant 0 : index
        %265 = vector.load %arg1[%c0_253, %263, %c0_254, %264, %c0_255] : memref<1x8x6x32x128xf32, #tpu.memory_space<vmem>>, vector<1x1x1x8x128xf32>
        %266 = vector.shape_cast %265 : vector<1x1x1x8x128xf32> to vector<8x128xf32>
        %267 = arith.addf %256, %266 : vector<8x128xf32>
        %268 = vector.broadcast %56 : f32 to vector<8x128xf32>
        %269 = arith.mulf %207, %268 : vector<8x128xf32>
        %270 = vector.broadcast %6 : f32 to vector<8x128xf32>
        %271 = arith.addf %270, %269 : vector<8x128xf32>
        %272 = arith.addf %arg10, %271 : vector<8x128xf32>
        %c0_i32_256 = arith.constant 0 : i32
        %273 = vector.broadcast %c0_i32_256 : i32 to vector<8x128xi32>
        %274 = vector.broadcast %59 : f32 to vector<8x128xf32>
        %275 = arith.mulf %207, %274 : vector<8x128xf32>
        %276 = vector.broadcast %7 : f32 to vector<8x128xf32>
        %277 = arith.addf %276, %275 : vector<8x128xf32>
        %278 = arith.addf %arg11, %277 : vector<8x128xf32>
        %279 = arith.cmpf ogt, %278, %272 : vector<8x128xf32>
        %280 = arith.select %279, %278, %272 : vector<8x128xi1>, vector<8x128xf32>
        %c1_i32_257 = arith.constant 1 : i32
        %281 = vector.broadcast %c1_i32_257 : i32 to vector<8x128xi32>
        %282 = arith.select %279, %281, %273 : vector<8x128xi1>, vector<8x128xi32>
        %283 = vector.broadcast %62 : f32 to vector<8x128xf32>
        %284 = arith.mulf %207, %283 : vector<8x128xf32>
        %285 = vector.broadcast %8 : f32 to vector<8x128xf32>
        %286 = arith.addf %285, %284 : vector<8x128xf32>
        %287 = arith.addf %arg12, %286 : vector<8x128xf32>
        %288 = arith.cmpf ogt, %287, %280 : vector<8x128xf32>
        %289 = arith.select %288, %287, %280 : vector<8x128xi1>, vector<8x128xf32>
        %c2_i32_258 = arith.constant 2 : i32
        %290 = vector.broadcast %c2_i32_258 : i32 to vector<8x128xi32>
        %291 = arith.select %288, %290, %282 : vector<8x128xi1>, vector<8x128xi32>
        %292 = vector.broadcast %65 : f32 to vector<8x128xf32>
        %293 = arith.mulf %207, %292 : vector<8x128xf32>
        %294 = vector.broadcast %9 : f32 to vector<8x128xf32>
        %295 = arith.addf %294, %293 : vector<8x128xf32>
        %296 = arith.addf %arg13, %295 : vector<8x128xf32>
        %297 = arith.cmpf ogt, %296, %289 : vector<8x128xf32>
        %298 = arith.select %297, %296, %289 : vector<8x128xi1>, vector<8x128xf32>
        %c3_i32_259 = arith.constant 3 : i32
        %299 = vector.broadcast %c3_i32_259 : i32 to vector<8x128xi32>
        %300 = arith.select %297, %299, %291 : vector<8x128xi1>, vector<8x128xi32>
        %301 = vector.broadcast %68 : f32 to vector<8x128xf32>
        %302 = arith.mulf %207, %301 : vector<8x128xf32>
        %303 = vector.broadcast %10 : f32 to vector<8x128xf32>
        %304 = arith.addf %303, %302 : vector<8x128xf32>
        %305 = arith.addf %arg14, %304 : vector<8x128xf32>
        %306 = arith.cmpf ogt, %305, %298 : vector<8x128xf32>
        %307 = arith.select %306, %305, %298 : vector<8x128xi1>, vector<8x128xf32>
        %c4_i32_260 = arith.constant 4 : i32
        %308 = vector.broadcast %c4_i32_260 : i32 to vector<8x128xi32>
        %309 = arith.select %306, %308, %300 : vector<8x128xi1>, vector<8x128xi32>
        %310 = vector.broadcast %71 : f32 to vector<8x128xf32>
        %311 = arith.mulf %207, %310 : vector<8x128xf32>
        %312 = vector.broadcast %11 : f32 to vector<8x128xf32>
        %313 = arith.addf %312, %311 : vector<8x128xf32>
        %314 = arith.addf %arg15, %313 : vector<8x128xf32>
        %315 = arith.cmpf ogt, %314, %307 : vector<8x128xf32>
        %316 = arith.select %315, %314, %307 : vector<8x128xi1>, vector<8x128xf32>
        %c5_i32_261 = arith.constant 5 : i32
        %317 = vector.broadcast %c5_i32_261 : i32 to vector<8x128xi32>
        %318 = arith.select %315, %317, %309 : vector<8x128xi1>, vector<8x128xi32>
        %319 = arith.index_cast %arg9 : i32 to index
        %c1_262 = arith.constant 1 : index
        %c0_263 = arith.constant 0 : index
        %c0_264 = arith.constant 0 : index
        %320 = vector.load %arg7[%319, %c1_262, %c0_263, %c0_264] : memref<8x6x8x128xi32, #tpu.memory_space<vmem>>, vector<1x1x8x128xi32>
        %321 = vector.shape_cast %320 : vector<1x1x8x128xi32> to vector<8x128xi32>
        %322 = vector.shape_cast %318 : vector<8x128xi32> to vector<1x1x8x128xi32>
        tpu.vector_store %arg7[%319, %c1_262, %c0_263, %c0_264], %322 {strides = array<i32>} : memref<8x6x8x128xi32, #tpu.memory_space<vmem>>, vector<1x1x8x128xi32>,
        %c0_265 = arith.constant 0 : index
        %323 = arith.index_cast %arg9 : i32 to index
        %c1_266 = arith.constant 1 : index
        %324 = arith.index_cast %152 : i32 to index
        %c0_267 = arith.constant 0 : index
        %325 = vector.load %arg1[%c0_265, %323, %c1_266, %324, %c0_267] : memref<1x8x6x32x128xf32, #tpu.memory_space<vmem>>, vector<1x1x1x8x128xf32>
        %326 = vector.shape_cast %325 : vector<1x1x1x8x128xf32> to vector<8x128xf32>
        %327 = arith.addf %316, %326 : vector<8x128xf32>
        %328 = vector.broadcast %74 : f32 to vector<8x128xf32>
        %329 = arith.mulf %207, %328 : vector<8x128xf32>
        %330 = vector.broadcast %12 : f32 to vector<8x128xf32>
        %331 = arith.addf %330, %329 : vector<8x128xf32>
        %332 = arith.addf %arg10, %331 : vector<8x128xf32>
        %c0_i32_268 = arith.constant 0 : i32
        %333 = vector.broadcast %c0_i32_268 : i32 to vector<8x128xi32>
        %334 = vector.broadcast %77 : f32 to vector<8x128xf32>
        %335 = arith.mulf %207, %334 : vector<8x128xf32>
        %336 = vector.broadcast %13 : f32 to vector<8x128xf32>
        %337 = arith.addf %336, %335 : vector<8x128xf32>
        %338 = arith.addf %arg11, %337 : vector<8x128xf32>
        %339 = arith.cmpf ogt, %338, %332 : vector<8x128xf32>
        %340 = arith.select %339, %338, %332 : vector<8x128xi1>, vector<8x128xf32>
        %c1_i32_269 = arith.constant 1 : i32
        %341 = vector.broadcast %c1_i32_269 : i32 to vector<8x128xi32>
        %342 = arith.select %339, %341, %333 : vector<8x128xi1>, vector<8x128xi32>
        %343 = vector.broadcast %80 : f32 to vector<8x128xf32>
        %344 = arith.mulf %207, %343 : vector<8x128xf32>
        %345 = vector.broadcast %14 : f32 to vector<8x128xf32>
        %346 = arith.addf %345, %344 : vector<8x128xf32>
        %347 = arith.addf %arg12, %346 : vector<8x128xf32>
        %348 = arith.cmpf ogt, %347, %340 : vector<8x128xf32>
        %349 = arith.select %348, %347, %340 : vector<8x128xi1>, vector<8x128xf32>
        %c2_i32_270 = arith.constant 2 : i32
        %350 = vector.broadcast %c2_i32_270 : i32 to vector<8x128xi32>
        %351 = arith.select %348, %350, %342 : vector<8x128xi1>, vector<8x128xi32>
        %352 = vector.broadcast %83 : f32 to vector<8x128xf32>
        %353 = arith.mulf %207, %352 : vector<8x128xf32>
        %354 = vector.broadcast %15 : f32 to vector<8x128xf32>
        %355 = arith.addf %354, %353 : vector<8x128xf32>
        %356 = arith.addf %arg13, %355 : vector<8x128xf32>
        %357 = arith.cmpf ogt, %356, %349 : vector<8x128xf32>
        %358 = arith.select %357, %356, %349 : vector<8x128xi1>, vector<8x128xf32>
        %c3_i32_271 = arith.constant 3 : i32
        %359 = vector.broadcast %c3_i32_271 : i32 to vector<8x128xi32>
        %360 = arith.select %357, %359, %351 : vector<8x128xi1>, vector<8x128xi32>
        %361 = vector.broadcast %86 : f32 to vector<8x128xf32>
        %362 = arith.mulf %207, %361 : vector<8x128xf32>
        %363 = vector.broadcast %16 : f32 to vector<8x128xf32>
        %364 = arith.addf %363, %362 : vector<8x128xf32>
        %365 = arith.addf %arg14, %364 : vector<8x128xf32>
        %366 = arith.cmpf ogt, %365, %358 : vector<8x128xf32>
        %367 = arith.select %366, %365, %358 : vector<8x128xi1>, vector<8x128xf32>
        %c4_i32_272 = arith.constant 4 : i32
        %368 = vector.broadcast %c4_i32_272 : i32 to vector<8x128xi32>
        %369 = arith.select %366, %368, %360 : vector<8x128xi1>, vector<8x128xi32>
        %370 = vector.broadcast %89 : f32 to vector<8x128xf32>
        %371 = arith.mulf %207, %370 : vector<8x128xf32>
        %372 = vector.broadcast %17 : f32 to vector<8x128xf32>
        %373 = arith.addf %372, %371 : vector<8x128xf32>
        %374 = arith.addf %arg15, %373 : vector<8x128xf32>
        %375 = arith.cmpf ogt, %374, %367 : vector<8x128xf32>
        %376 = arith.select %375, %374, %367 : vector<8x128xi1>, vector<8x128xf32>
        %c5_i32_273 = arith.constant 5 : i32
        %377 = vector.broadcast %c5_i32_273 : i32 to vector<8x128xi32>
        %378 = arith.select %375, %377, %369 : vector<8x128xi1>, vector<8x128xi32>
        %379 = arith.index_cast %arg9 : i32 to index
        %c2_274 = arith.constant 2 : index
        %c0_275 = arith.constant 0 : index
        %c0_276 = arith.constant 0 : index
        %380 = vector.load %arg7[%379, %c2_274, %c0_275, %c0_276] : memref<8x6x8x128xi32, #tpu.memory_space<vmem>>, vector<1x1x8x128xi32>
        %381 = vector.shape_cast %380 : vector<1x1x8x128xi32> to vector<8x128xi32>
        %382 = vector.shape_cast %378 : vector<8x128xi32> to vector<1x1x8x128xi32>
        tpu.vector_store %arg7[%379, %c2_274, %c0_275, %c0_276], %382 {strides = array<i32>} : memref<8x6x8x128xi32, #tpu.memory_space<vmem>>, vector<1x1x8x128xi32>,
        %c0_277 = arith.constant 0 : index
        %383 = arith.index_cast %arg9 : i32 to index
        %c2_278 = arith.constant 2 : index
        %384 = arith.index_cast %152 : i32 to index
        %c0_279 = arith.constant 0 : index
        %385 = vector.load %arg1[%c0_277, %383, %c2_278, %384, %c0_279] : memref<1x8x6x32x128xf32, #tpu.memory_space<vmem>>, vector<1x1x1x8x128xf32>
        %386 = vector.shape_cast %385 : vector<1x1x1x8x128xf32> to vector<8x128xf32>
        %387 = arith.addf %376, %386 : vector<8x128xf32>
        %388 = vector.broadcast %92 : f32 to vector<8x128xf32>
        %389 = arith.mulf %207, %388 : vector<8x128xf32>
        %390 = vector.broadcast %18 : f32 to vector<8x128xf32>
        %391 = arith.addf %390, %389 : vector<8x128xf32>
        %392 = arith.addf %arg10, %391 : vector<8x128xf32>
        %c0_i32_280 = arith.constant 0 : i32
        %393 = vector.broadcast %c0_i32_280 : i32 to vector<8x128xi32>
        %394 = vector.broadcast %95 : f32 to vector<8x128xf32>
        %395 = arith.mulf %207, %394 : vector<8x128xf32>
        %396 = vector.broadcast %19 : f32 to vector<8x128xf32>
        %397 = arith.addf %396, %395 : vector<8x128xf32>
        %398 = arith.addf %arg11, %397 : vector<8x128xf32>
        %399 = arith.cmpf ogt, %398, %392 : vector<8x128xf32>
        %400 = arith.select %399, %398, %392 : vector<8x128xi1>, vector<8x128xf32>
        %c1_i32_281 = arith.constant 1 : i32
        %401 = vector.broadcast %c1_i32_281 : i32 to vector<8x128xi32>
        %402 = arith.select %399, %401, %393 : vector<8x128xi1>, vector<8x128xi32>
        %403 = vector.broadcast %98 : f32 to vector<8x128xf32>
        %404 = arith.mulf %207, %403 : vector<8x128xf32>
        %405 = vector.broadcast %20 : f32 to vector<8x128xf32>
        %406 = arith.addf %405, %404 : vector<8x128xf32>
        %407 = arith.addf %arg12, %406 : vector<8x128xf32>
        %408 = arith.cmpf ogt, %407, %400 : vector<8x128xf32>
        %409 = arith.select %408, %407, %400 : vector<8x128xi1>, vector<8x128xf32>
        %c2_i32_282 = arith.constant 2 : i32
        %410 = vector.broadcast %c2_i32_282 : i32 to vector<8x128xi32>
        %411 = arith.select %408, %410, %402 : vector<8x128xi1>, vector<8x128xi32>
        %412 = vector.broadcast %101 : f32 to vector<8x128xf32>
        %413 = arith.mulf %207, %412 : vector<8x128xf32>
        %414 = vector.broadcast %21 : f32 to vector<8x128xf32>
        %415 = arith.addf %414, %413 : vector<8x128xf32>
        %416 = arith.addf %arg13, %415 : vector<8x128xf32>
        %417 = arith.cmpf ogt, %416, %409 : vector<8x128xf32>
        %418 = arith.select %417, %416, %409 : vector<8x128xi1>, vector<8x128xf32>
        %c3_i32_283 = arith.constant 3 : i32
        %419 = vector.broadcast %c3_i32_283 : i32 to vector<8x128xi32>
        %420 = arith.select %417, %419, %411 : vector<8x128xi1>, vector<8x128xi32>
        %421 = vector.broadcast %104 : f32 to vector<8x128xf32>
        %422 = arith.mulf %207, %421 : vector<8x128xf32>
        %423 = vector.broadcast %22 : f32 to vector<8x128xf32>
        %424 = arith.addf %423, %422 : vector<8x128xf32>
        %425 = arith.addf %arg14, %424 : vector<8x128xf32>
        %426 = arith.cmpf ogt, %425, %418 : vector<8x128xf32>
        %427 = arith.select %426, %425, %418 : vector<8x128xi1>, vector<8x128xf32>
        %c4_i32_284 = arith.constant 4 : i32
        %428 = vector.broadcast %c4_i32_284 : i32 to vector<8x128xi32>
        %429 = arith.select %426, %428, %420 : vector<8x128xi1>, vector<8x128xi32>
        %430 = vector.broadcast %107 : f32 to vector<8x128xf32>
        %431 = arith.mulf %207, %430 : vector<8x128xf32>
        %432 = vector.broadcast %23 : f32 to vector<8x128xf32>
        %433 = arith.addf %432, %431 : vector<8x128xf32>
        %434 = arith.addf %arg15, %433 : vector<8x128xf32>
        %435 = arith.cmpf ogt, %434, %427 : vector<8x128xf32>
        %436 = arith.select %435, %434, %427 : vector<8x128xi1>, vector<8x128xf32>
        %c5_i32_285 = arith.constant 5 : i32
        %437 = vector.broadcast %c5_i32_285 : i32 to vector<8x128xi32>
        %438 = arith.select %435, %437, %429 : vector<8x128xi1>, vector<8x128xi32>
        %439 = arith.index_cast %arg9 : i32 to index
        %c3_286 = arith.constant 3 : index
        %c0_287 = arith.constant 0 : index
        %c0_288 = arith.constant 0 : index
        %440 = vector.load %arg7[%439, %c3_286, %c0_287, %c0_288] : memref<8x6x8x128xi32, #tpu.memory_space<vmem>>, vector<1x1x8x128xi32>
        %441 = vector.shape_cast %440 : vector<1x1x8x128xi32> to vector<8x128xi32>
        %442 = vector.shape_cast %438 : vector<8x128xi32> to vector<1x1x8x128xi32>
        tpu.vector_store %arg7[%439, %c3_286, %c0_287, %c0_288], %442 {strides = array<i32>} : memref<8x6x8x128xi32, #tpu.memory_space<vmem>>, vector<1x1x8x128xi32>,
        %c0_289 = arith.constant 0 : index
        %443 = arith.index_cast %arg9 : i32 to index
        %c3_290 = arith.constant 3 : index
        %444 = arith.index_cast %152 : i32 to index
        %c0_291 = arith.constant 0 : index
        %445 = vector.load %arg1[%c0_289, %443, %c3_290, %444, %c0_291] : memref<1x8x6x32x128xf32, #tpu.memory_space<vmem>>, vector<1x1x1x8x128xf32>
        %446 = vector.shape_cast %445 : vector<1x1x1x8x128xf32> to vector<8x128xf32>
        %447 = arith.addf %436, %446 : vector<8x128xf32>
        %448 = vector.broadcast %110 : f32 to vector<8x128xf32>
        %449 = arith.mulf %207, %448 : vector<8x128xf32>
        %450 = vector.broadcast %24 : f32 to vector<8x128xf32>
        %451 = arith.addf %450, %449 : vector<8x128xf32>
        %452 = arith.addf %arg10, %451 : vector<8x128xf32>
        %c0_i32_292 = arith.constant 0 : i32
        %453 = vector.broadcast %c0_i32_292 : i32 to vector<8x128xi32>
        %454 = vector.broadcast %113 : f32 to vector<8x128xf32>
        %455 = arith.mulf %207, %454 : vector<8x128xf32>
        %456 = vector.broadcast %25 : f32 to vector<8x128xf32>
        %457 = arith.addf %456, %455 : vector<8x128xf32>
        %458 = arith.addf %arg11, %457 : vector<8x128xf32>
        %459 = arith.cmpf ogt, %458, %452 : vector<8x128xf32>
        %460 = arith.select %459, %458, %452 : vector<8x128xi1>, vector<8x128xf32>
        %c1_i32_293 = arith.constant 1 : i32
        %461 = vector.broadcast %c1_i32_293 : i32 to vector<8x128xi32>
        %462 = arith.select %459, %461, %453 : vector<8x128xi1>, vector<8x128xi32>
        %463 = vector.broadcast %116 : f32 to vector<8x128xf32>
        %464 = arith.mulf %207, %463 : vector<8x128xf32>
        %465 = vector.broadcast %26 : f32 to vector<8x128xf32>
        %466 = arith.addf %465, %464 : vector<8x128xf32>
        %467 = arith.addf %arg12, %466 : vector<8x128xf32>
        %468 = arith.cmpf ogt, %467, %460 : vector<8x128xf32>
        %469 = arith.select %468, %467, %460 : vector<8x128xi1>, vector<8x128xf32>
        %c2_i32_294 = arith.constant 2 : i32
        %470 = vector.broadcast %c2_i32_294 : i32 to vector<8x128xi32>
        %471 = arith.select %468, %470, %462 : vector<8x128xi1>, vector<8x128xi32>
        %472 = vector.broadcast %119 : f32 to vector<8x128xf32>
        %473 = arith.mulf %207, %472 : vector<8x128xf32>
        %474 = vector.broadcast %27 : f32 to vector<8x128xf32>
        %475 = arith.addf %474, %473 : vector<8x128xf32>
        %476 = arith.addf %arg13, %475 : vector<8x128xf32>
        %477 = arith.cmpf ogt, %476, %469 : vector<8x128xf32>
        %478 = arith.select %477, %476, %469 : vector<8x128xi1>, vector<8x128xf32>
        %c3_i32_295 = arith.constant 3 : i32
        %479 = vector.broadcast %c3_i32_295 : i32 to vector<8x128xi32>
        %480 = arith.select %477, %479, %471 : vector<8x128xi1>, vector<8x128xi32>
        %481 = vector.broadcast %122 : f32 to vector<8x128xf32>
        %482 = arith.mulf %207, %481 : vector<8x128xf32>
        %483 = vector.broadcast %28 : f32 to vector<8x128xf32>
        %484 = arith.addf %483, %482 : vector<8x128xf32>
        %485 = arith.addf %arg14, %484 : vector<8x128xf32>
        %486 = arith.cmpf ogt, %485, %478 : vector<8x128xf32>
        %487 = arith.select %486, %485, %478 : vector<8x128xi1>, vector<8x128xf32>
        %c4_i32_296 = arith.constant 4 : i32
        %488 = vector.broadcast %c4_i32_296 : i32 to vector<8x128xi32>
        %489 = arith.select %486, %488, %480 : vector<8x128xi1>, vector<8x128xi32>
        %490 = vector.broadcast %125 : f32 to vector<8x128xf32>
        %491 = arith.mulf %207, %490 : vector<8x128xf32>
        %492 = vector.broadcast %29 : f32 to vector<8x128xf32>
        %493 = arith.addf %492, %491 : vector<8x128xf32>
        %494 = arith.addf %arg15, %493 : vector<8x128xf32>
        %495 = arith.cmpf ogt, %494, %487 : vector<8x128xf32>
        %496 = arith.select %495, %494, %487 : vector<8x128xi1>, vector<8x128xf32>
        %c5_i32_297 = arith.constant 5 : i32
        %497 = vector.broadcast %c5_i32_297 : i32 to vector<8x128xi32>
        %498 = arith.select %495, %497, %489 : vector<8x128xi1>, vector<8x128xi32>
        %499 = arith.index_cast %arg9 : i32 to index
        %c4_298 = arith.constant 4 : index
        %c0_299 = arith.constant 0 : index
        %c0_300 = arith.constant 0 : index
        %500 = vector.load %arg7[%499, %c4_298, %c0_299, %c0_300] : memref<8x6x8x128xi32, #tpu.memory_space<vmem>>, vector<1x1x8x128xi32>
        %501 = vector.shape_cast %500 : vector<1x1x8x128xi32> to vector<8x128xi32>
        %502 = vector.shape_cast %498 : vector<8x128xi32> to vector<1x1x8x128xi32>
        tpu.vector_store %arg7[%499, %c4_298, %c0_299, %c0_300], %502 {strides = array<i32>} : memref<8x6x8x128xi32, #tpu.memory_space<vmem>>, vector<1x1x8x128xi32>,
        %c0_301 = arith.constant 0 : index
        %503 = arith.index_cast %arg9 : i32 to index
        %c4_302 = arith.constant 4 : index
        %504 = arith.index_cast %152 : i32 to index
        %c0_303 = arith.constant 0 : index
        %505 = vector.load %arg1[%c0_301, %503, %c4_302, %504, %c0_303] : memref<1x8x6x32x128xf32, #tpu.memory_space<vmem>>, vector<1x1x1x8x128xf32>
        %506 = vector.shape_cast %505 : vector<1x1x1x8x128xf32> to vector<8x128xf32>
        %507 = arith.addf %496, %506 : vector<8x128xf32>
        %508 = vector.broadcast %128 : f32 to vector<8x128xf32>
        %509 = arith.mulf %207, %508 : vector<8x128xf32>
        %510 = vector.broadcast %30 : f32 to vector<8x128xf32>
        %511 = arith.addf %510, %509 : vector<8x128xf32>
        %512 = arith.addf %arg10, %511 : vector<8x128xf32>
        %c0_i32_304 = arith.constant 0 : i32
        %513 = vector.broadcast %c0_i32_304 : i32 to vector<8x128xi32>
        %514 = vector.broadcast %131 : f32 to vector<8x128xf32>
        %515 = arith.mulf %207, %514 : vector<8x128xf32>
        %516 = vector.broadcast %31 : f32 to vector<8x128xf32>
        %517 = arith.addf %516, %515 : vector<8x128xf32>
        %518 = arith.addf %arg11, %517 : vector<8x128xf32>
        %519 = arith.cmpf ogt, %518, %512 : vector<8x128xf32>
        %520 = arith.select %519, %518, %512 : vector<8x128xi1>, vector<8x128xf32>
        %c1_i32_305 = arith.constant 1 : i32
        %521 = vector.broadcast %c1_i32_305 : i32 to vector<8x128xi32>
        %522 = arith.select %519, %521, %513 : vector<8x128xi1>, vector<8x128xi32>
        %523 = vector.broadcast %134 : f32 to vector<8x128xf32>
        %524 = arith.mulf %207, %523 : vector<8x128xf32>
        %525 = vector.broadcast %32 : f32 to vector<8x128xf32>
        %526 = arith.addf %525, %524 : vector<8x128xf32>
        %527 = arith.addf %arg12, %526 : vector<8x128xf32>
        %528 = arith.cmpf ogt, %527, %520 : vector<8x128xf32>
        %529 = arith.select %528, %527, %520 : vector<8x128xi1>, vector<8x128xf32>
        %c2_i32_306 = arith.constant 2 : i32
        %530 = vector.broadcast %c2_i32_306 : i32 to vector<8x128xi32>
        %531 = arith.select %528, %530, %522 : vector<8x128xi1>, vector<8x128xi32>
        %532 = vector.broadcast %137 : f32 to vector<8x128xf32>
        %533 = arith.mulf %207, %532 : vector<8x128xf32>
        %534 = vector.broadcast %33 : f32 to vector<8x128xf32>
        %535 = arith.addf %534, %533 : vector<8x128xf32>
        %536 = arith.addf %arg13, %535 : vector<8x128xf32>
        %537 = arith.cmpf ogt, %536, %529 : vector<8x128xf32>
        %538 = arith.select %537, %536, %529 : vector<8x128xi1>, vector<8x128xf32>
        %c3_i32_307 = arith.constant 3 : i32
        %539 = vector.broadcast %c3_i32_307 : i32 to vector<8x128xi32>
        %540 = arith.select %537, %539, %531 : vector<8x128xi1>, vector<8x128xi32>
        %541 = vector.broadcast %140 : f32 to vector<8x128xf32>
        %542 = arith.mulf %207, %541 : vector<8x128xf32>
        %543 = vector.broadcast %34 : f32 to vector<8x128xf32>
        %544 = arith.addf %543, %542 : vector<8x128xf32>
        %545 = arith.addf %arg14, %544 : vector<8x128xf32>
        %546 = arith.cmpf ogt, %545, %538 : vector<8x128xf32>
        %547 = arith.select %546, %545, %538 : vector<8x128xi1>, vector<8x128xf32>
        %c4_i32_308 = arith.constant 4 : i32
        %548 = vector.broadcast %c4_i32_308 : i32 to vector<8x128xi32>
        %549 = arith.select %546, %548, %540 : vector<8x128xi1>, vector<8x128xi32>
        %550 = vector.broadcast %143 : f32 to vector<8x128xf32>
        %551 = arith.mulf %207, %550 : vector<8x128xf32>
        %552 = vector.broadcast %35 : f32 to vector<8x128xf32>
        %553 = arith.addf %552, %551 : vector<8x128xf32>
        %554 = arith.addf %arg15, %553 : vector<8x128xf32>
        %555 = arith.cmpf ogt, %554, %547 : vector<8x128xf32>
        %556 = arith.select %555, %554, %547 : vector<8x128xi1>, vector<8x128xf32>
        %c5_i32_309 = arith.constant 5 : i32
        %557 = vector.broadcast %c5_i32_309 : i32 to vector<8x128xi32>
        %558 = arith.select %555, %557, %549 : vector<8x128xi1>, vector<8x128xi32>
        %559 = arith.index_cast %arg9 : i32 to index
        %c5_310 = arith.constant 5 : index
        %c0_311 = arith.constant 0 : index
        %c0_312 = arith.constant 0 : index
        %560 = vector.load %arg7[%559, %c5_310, %c0_311, %c0_312] : memref<8x6x8x128xi32, #tpu.memory_space<vmem>>, vector<1x1x8x128xi32>
        %561 = vector.shape_cast %560 : vector<1x1x8x128xi32> to vector<8x128xi32>
        %562 = vector.shape_cast %558 : vector<8x128xi32> to vector<1x1x8x128xi32>
        tpu.vector_store %arg7[%559, %c5_310, %c0_311, %c0_312], %562 {strides = array<i32>} : memref<8x6x8x128xi32, #tpu.memory_space<vmem>>, vector<1x1x8x128xi32>,
        %c0_313 = arith.constant 0 : index
        %563 = arith.index_cast %arg9 : i32 to index
        %c5_314 = arith.constant 5 : index
        %564 = arith.index_cast %152 : i32 to index
        %c0_315 = arith.constant 0 : index
        %565 = vector.load %arg1[%c0_313, %563, %c5_314, %564, %c0_315] : memref<1x8x6x32x128xf32, #tpu.memory_space<vmem>>, vector<1x1x1x8x128xf32>
        %566 = vector.shape_cast %565 : vector<1x1x1x8x128xf32> to vector<8x128xf32>
        %567 = arith.addf %556, %566 : vector<8x128xf32>
        scf.yield %267, %327, %387, %447, %507, %567 : vector<8x128xf32>, vector<8x128xf32>, vector<8x128xf32>, vector<8x128xf32>, vector<8x128xf32>, vector<8x128xf32>
      }
      %c8_i32_231 = arith.constant 8 : i32
      %161 = vector.broadcast %144 : f32 to vector<8x128xf32>
      %162 = arith.addf %160#0, %161 : vector<8x128xf32>
      %c0_i32_232 = arith.constant 0 : i32
      %163 = vector.broadcast %c0_i32_232 : i32 to vector<8x128xi32>
      %164 = vector.broadcast %145 : f32 to vector<8x128xf32>
      %165 = arith.addf %160#1, %164 : vector<8x128xf32>
      %166 = arith.cmpf ogt, %165, %162 : vector<8x128xf32>
      %167 = arith.select %166, %165, %162 : vector<8x128xi1>, vector<8x128xf32>
      %c1_i32_233 = arith.constant 1 : i32
      %168 = vector.broadcast %c1_i32_233 : i32 to vector<8x128xi32>
      %169 = arith.select %166, %168, %163 : vector<8x128xi1>, vector<8x128xi32>
      %170 = vector.broadcast %146 : f32 to vector<8x128xf32>
      %171 = arith.addf %160#2, %170 : vector<8x128xf32>
      %172 = arith.cmpf ogt, %171, %167 : vector<8x128xf32>
      %173 = arith.select %172, %171, %167 : vector<8x128xi1>, vector<8x128xf32>
      %c2_i32 = arith.constant 2 : i32
      %174 = vector.broadcast %c2_i32 : i32 to vector<8x128xi32>
      %175 = arith.select %172, %174, %169 : vector<8x128xi1>, vector<8x128xi32>
      %176 = vector.broadcast %147 : f32 to vector<8x128xf32>
      %177 = arith.addf %160#3, %176 : vector<8x128xf32>
      %178 = arith.cmpf ogt, %177, %173 : vector<8x128xf32>
      %179 = arith.select %178, %177, %173 : vector<8x128xi1>, vector<8x128xf32>
      %c3_i32 = arith.constant 3 : i32
      %180 = vector.broadcast %c3_i32 : i32 to vector<8x128xi32>
      %181 = arith.select %178, %180, %175 : vector<8x128xi1>, vector<8x128xi32>
      %182 = vector.broadcast %148 : f32 to vector<8x128xf32>
      %183 = arith.addf %160#4, %182 : vector<8x128xf32>
      %184 = arith.cmpf ogt, %183, %179 : vector<8x128xf32>
      %185 = arith.select %184, %183, %179 : vector<8x128xi1>, vector<8x128xf32>
      %c4_i32_234 = arith.constant 4 : i32
      %186 = vector.broadcast %c4_i32_234 : i32 to vector<8x128xi32>
      %187 = arith.select %184, %186, %181 : vector<8x128xi1>, vector<8x128xi32>
      %188 = vector.broadcast %149 : f32 to vector<8x128xf32>
      %189 = arith.addf %160#5, %188 : vector<8x128xf32>
      %190 = arith.cmpf ogt, %189, %185 : vector<8x128xf32>
      %191 = arith.select %190, %189, %185 : vector<8x128xi1>, vector<8x128xf32>
      %c5_i32 = arith.constant 5 : i32
      %192 = vector.broadcast %c5_i32 : i32 to vector<8x128xi32>
      %193 = arith.select %190, %192, %187 : vector<8x128xi1>, vector<8x128xi32>
      %c0_235 = arith.constant 0 : index
      %194 = arith.index_cast %152 : i32 to index
      %c0_236 = arith.constant 0 : index
      %195 = vector.load %arg5[%c0_235, %194, %c0_236] : memref<1x32x128xf32, #tpu.memory_space<vmem>>, vector<1x8x128xf32>
      %196 = vector.shape_cast %195 : vector<1x8x128xf32> to vector<8x128xf32>
      %197 = vector.shape_cast %191 : vector<8x128xf32> to vector<1x8x128xf32>
      tpu.vector_store %arg5[%c0_235, %194, %c0_236], %197 {strides = array<i32>} : memref<1x32x128xf32, #tpu.memory_space<vmem>>, vector<1x8x128xf32>,
      %c0_237 = arith.constant 0 : index
      %c7 = arith.constant 7 : index
      %198 = arith.index_cast %152 : i32 to index
      %c0_238 = arith.constant 0 : index
      %199 = vector.load %arg6[%c0_237, %c7, %198, %c0_238] : memref<1x8x32x128xi32, #tpu.memory_space<vmem>>, vector<1x1x8x128xi32>
      %200 = vector.shape_cast %199 : vector<1x1x8x128xi32> to vector<8x128xi32>
      %201 = vector.shape_cast %193 : vector<8x128xi32> to vector<1x1x8x128xi32>
      tpu.vector_store %arg6[%c0_237, %c7, %198, %c0_238], %201 {strides = array<i32>} : memref<1x8x32x128xi32, #tpu.memory_space<vmem>>, vector<1x1x8x128xi32>,
      %c0_i32_239 = arith.constant 0 : i32
      %c7_i32 = arith.constant 7 : i32
      %202 = arith.addi %c0_i32_239, %c7_i32 : i32
      %c1_i32_240 = arith.constant 1 : i32
      %203 = scf.for %arg9 = %c0_i32_239 to %202 step %c1_i32_240 iter_args(%arg10 = %193) -> (vector<8x128xi32>)  : i32 {
        %c7_i32_242 = arith.constant 7 : i32
        %204 = arith.subi %c7_i32_242, %arg9 : i32
        %205 = arith.index_cast %204 : i32 to index
        %c0_243 = arith.constant 0 : index
        %c0_244 = arith.constant 0 : index
        %c0_245 = arith.constant 0 : index
        %206 = vector.load %arg7[%205, %c0_243, %c0_244, %c0_245] : memref<8x6x8x128xi32, #tpu.memory_space<vmem>>, vector<1x1x8x128xi32>
        %207 = vector.shape_cast %206 : vector<1x1x8x128xi32> to vector<8x128xi32>
        %c1_i32_246 = arith.constant 1 : i32
        %208 = vector.broadcast %c1_i32_246 : i32 to vector<8x128xi32>
        %209 = arith.cmpi eq, %arg10, %208 : vector<8x128xi32>
        %210 = arith.index_cast %204 : i32 to index
        %c1_247 = arith.constant 1 : index
        %c0_248 = arith.constant 0 : index
        %c0_249 = arith.constant 0 : index
        %211 = vector.load %arg7[%210, %c1_247, %c0_248, %c0_249] : memref<8x6x8x128xi32, #tpu.memory_space<vmem>>, vector<1x1x8x128xi32>
        %212 = vector.shape_cast %211 : vector<1x1x8x128xi32> to vector<8x128xi32>
        %213 = arith.select %209, %212, %207 : vector<8x128xi1>, vector<8x128xi32>
        %c2_i32_250 = arith.constant 2 : i32
        %214 = vector.broadcast %c2_i32_250 : i32 to vector<8x128xi32>
        %215 = arith.cmpi eq, %arg10, %214 : vector<8x128xi32>
        %216 = arith.index_cast %204 : i32 to index
        %c2_251 = arith.constant 2 : index
        %c0_252 = arith.constant 0 : index
        %c0_253 = arith.constant 0 : index
        %217 = vector.load %arg7[%216, %c2_251, %c0_252, %c0_253] : memref<8x6x8x128xi32, #tpu.memory_space<vmem>>, vector<1x1x8x128xi32>
        %218 = vector.shape_cast %217 : vector<1x1x8x128xi32> to vector<8x128xi32>
        %219 = arith.select %215, %218, %213 : vector<8x128xi1>, vector<8x128xi32>
        %c3_i32_254 = arith.constant 3 : i32
        %220 = vector.broadcast %c3_i32_254 : i32 to vector<8x128xi32>
        %221 = arith.cmpi eq, %arg10, %220 : vector<8x128xi32>
        %222 = arith.index_cast %204 : i32 to index
        %c3_255 = arith.constant 3 : index
        %c0_256 = arith.constant 0 : index
        %c0_257 = arith.constant 0 : index
        %223 = vector.load %arg7[%222, %c3_255, %c0_256, %c0_257] : memref<8x6x8x128xi32, #tpu.memory_space<vmem>>, vector<1x1x8x128xi32>
        %224 = vector.shape_cast %223 : vector<1x1x8x128xi32> to vector<8x128xi32>
        %225 = arith.select %221, %224, %219 : vector<8x128xi1>, vector<8x128xi32>
        %c4_i32_258 = arith.constant 4 : i32
        %226 = vector.broadcast %c4_i32_258 : i32 to vector<8x128xi32>
        %227 = arith.cmpi eq, %arg10, %226 : vector<8x128xi32>
        %228 = arith.index_cast %204 : i32 to index
        %c4_259 = arith.constant 4 : index
        %c0_260 = arith.constant 0 : index
        %c0_261 = arith.constant 0 : index
        %229 = vector.load %arg7[%228, %c4_259, %c0_260, %c0_261] : memref<8x6x8x128xi32, #tpu.memory_space<vmem>>, vector<1x1x8x128xi32>
        %230 = vector.shape_cast %229 : vector<1x1x8x128xi32> to vector<8x128xi32>
        %231 = arith.select %227, %230, %225 : vector<8x128xi1>, vector<8x128xi32>
        %c5_i32_262 = arith.constant 5 : i32
        %232 = vector.broadcast %c5_i32_262 : i32 to vector<8x128xi32>
        %233 = arith.cmpi eq, %arg10, %232 : vector<8x128xi32>
        %234 = arith.index_cast %204 : i32 to index
        %c5_263 = arith.constant 5 : index
        %c0_264 = arith.constant 0 : index
        %c0_265 = arith.constant 0 : index
        %235 = vector.load %arg7[%234, %c5_263, %c0_264, %c0_265] : memref<8x6x8x128xi32, #tpu.memory_space<vmem>>, vector<1x1x8x128xi32>
        %236 = vector.shape_cast %235 : vector<1x1x8x128xi32> to vector<8x128xi32>
        %237 = arith.select %233, %236, %231 : vector<8x128xi1>, vector<8x128xi32>
        %c1_i32_266 = arith.constant 1 : i32
        %238 = arith.subi %204, %c1_i32_266 : i32
        %c0_267 = arith.constant 0 : index
        %239 = arith.index_cast %238 : i32 to index
        %240 = arith.index_cast %152 : i32 to index
        %c0_268 = arith.constant 0 : index
        %241 = vector.load %arg6[%c0_267, %239, %240, %c0_268] : memref<1x8x32x128xi32, #tpu.memory_space<vmem>>, vector<1x1x8x128xi32>
        %242 = vector.shape_cast %241 : vector<1x1x8x128xi32> to vector<8x128xi32>
        %243 = vector.shape_cast %237 : vector<8x128xi32> to vector<1x1x8x128xi32>
        tpu.vector_store %arg6[%c0_267, %239, %240, %c0_268], %243 {strides = array<i32>} : memref<1x8x32x128xi32, #tpu.memory_space<vmem>>, vector<1x1x8x128xi32>,
        scf.yield %237 : vector<8x128xi32>
      }
      %c7_i32_241 = arith.constant 7 : i32
    }
    %c4_i32_222 = arith.constant 4 : i32
    return
  }
  func.func @transform_0(%arg0: i32) -> (i32, i32, i32, i32, i32) {
    %c0_i32 = arith.constant 0 : i32
    %c0_i32_0 = arith.constant 0 : i32
    %c0_i32_1 = arith.constant 0 : i32
    %c0_i32_2 = arith.constant 0 : i32
    %c0_i32_3 = arith.constant 0 : i32
    return %arg0, %c0_i32, %c0_i32_0, %c0_i32_1, %c0_i32_2 : i32, i32, i32, i32, i32
  }
  func.func @transform_1(%arg0: i32) -> (i32, i32, i32, i32) {
    %c0_i32 = arith.constant 0 : i32
    %c0_i32_0 = arith.constant 0 : i32
    %c0_i32_1 = arith.constant 0 : i32
    %c0_i32_2 = arith.constant 0 : i32
    return %arg0, %c0_i32, %c0_i32_0, %c0_i32_1 : i32, i32, i32, i32
  }
  func.func @transform_2(%arg0: i32) -> (i32, i32) {
    %c0_i32 = arith.constant 0 : i32
    %c0_i32_0 = arith.constant 0 : i32
    %c0_i32_1 = arith.constant 0 : i32
    return %c0_i32, %c0_i32_0 : i32, i32
  }
  func.func @transform_3(%arg0: i32) -> (i32, i32) {
    %c0_i32 = arith.constant 0 : i32
    %c0_i32_0 = arith.constant 0 : i32
    %c0_i32_1 = arith.constant 0 : i32
    return %c0_i32, %c0_i32_0 : i32, i32
  }
  func.func @transform_4(%arg0: i32) -> (i32, i32, i32) {
    %c0_i32 = arith.constant 0 : i32
    %c0_i32_0 = arith.constant 0 : i32
    %c0_i32_1 = arith.constant 0 : i32
    return %arg0, %c0_i32, %c0_i32_0 : i32, i32, i32
  }
  func.func @transform_5(%arg0: i32) -> (i32, i32, i32, i32) {
    %c0_i32 = arith.constant 0 : i32
    %c0_i32_0 = arith.constant 0 : i32
    %c0_i32_1 = arith.constant 0 : i32
    %c0_i32_2 = arith.constant 0 : i32
    return %arg0, %c0_i32, %c0_i32_0, %c0_i32_1 : i32, i32, i32, i32
  }
}

</mosaic_0001>

<bundles_post_ra>
// kernel: crf_forward_batch.1
= control target key start
LH: loop header
LB: loop body
LE: loop exit
PB: predicated region body
PF: predicated region fallthrough
CT: control target
= control target key end

     0   :  { %s2258_s0 = inlined_call_operand.vmem [shape: f32[2,8,6,32,128], index: 0, kind: input, shape index: {}]   ;;  %s2259_s1 = inlined_call_operand.vmem [shape: f32[2,8,32,128], index: 1, kind: input, shape index: {}]   ;;  %s2260_s2 = inlined_call_operand.vmem [shape: f32[6,6], index: 2, kind: input, shape index: {}]   ;;  %s2261_s3 = inlined_call_operand.vmem [shape: f32[6,6], index: 3, kind: input, shape index: {}]   ;;  %s2262_s4 = inlined_call_operand.hbm [shape: f32[2,32,128], index: 4, kind: output, shape index: {0}]   ;;  %s2263_s5 = inlined_call_operand.vmem [shape: s32[2,8,32,128], index: 5, kind: output, shape index: {1}]  }
   0x1   :  { %2366 = sst [smem:[#allocation92_spill]] %s2258_s0 }
   0x2   :  { %2367 = sst [smem:[#allocation93_spill]] %s2259_s1 }
   0x3   :  { %2368 = sst [smem:[#allocation94_spill]] %s2260_s2 }
   0x4   :  { %2369 = sst [smem:[#allocation95_spill]] %s2261_s3 }
   0x5   :  { %2370 = sst [smem:[#allocation96_spill]] %s2262_s4 }
   0x6   :  { %2371 = sst [smem:[#allocation97_spill]] %s2263_s5 }
   0x7   :  { %11 = vsyncpa [#allocation5], 0 }
   0x8   :  { %12 = vsyncpa [#allocation7], 0 }
   0x9   :  { %13 = vsyncpa [#allocation4], 0 }
   0xa   :  { %15 = vsyncpa [#allocation4 + $0x1], 0  ;;  %s1541_s18 = smov 0   ;;  %s1543_s19 = smov 0  }
   0xb   :  { %s1545_s20 = smov 0   ;;  %s1547_s21 = smov 0  }
   0xc LB: > { %2372 = sst [smem:[#allocation12_spill]] %s1450_s18  ;;  %s1562_s22 = sadd.s32 4294967295, %s1462_s21   ;;  %s1462_s21 = sphi %s1547_s21, %s2621_s21   ;;  %s1458_s20 = sphi %s1545_s20, %s2624_s20   ;;  %s1454_s19 = sphi %s1543_s19, %s2623_s19   ;;  %s1450_s18 = sphi %s1541_s18, %s2622_s18  }
   0xd   : > { %2373 = sst [smem:[#allocation13_spill]] %s1454_s19  ;;  %s1060_s23 = sadd.s32 4294967294, %s1462_s21  }
   0xe   : > { %2374 = sst [smem:[#allocation14_spill]] %s1458_s20  ;;  %s1566_s24 = sadd.s32 1, %s1462_s21  }
   0xf   : > { %2375 = sst [smem:[#allocation15_spill]] %s1462_s21  ;;  %s122_s25 = sadd.s32 1, %s1458_s20 }
  0x10   : > { %2376 = sst [smem:[#allocation16_spill]] %s1562_s22  ;;  %s119_s26 = ssub.s32 %s1462_s21, %s1566_s24 }
  0x11   : > { %2377 = sst [smem:[#allocation17_spill]] %s1566_s24  ;;  %p132_p0 = scmp.ne.s32.totalorder %s1458_s20, %s1454_s19 }
  0x12   : > { %p120_p1 = scmp.eq.s32.totalorder %s119_s26, 0  ;;  %p133_p2 = scmp.eq.s32.totalorder %s1562_s22, 1 }
  0x13   : > { %p138_p3 = scmp.ne.s32.totalorder %s1454_s19, %s1450_s18  ;;  %p139_p4 = scmp.eq.s32.totalorder %s1060_s23, 1 }
  0x14   : > { %s1577_s27 = scalar_select %p120_p1, %s1458_s20, %s122_s25  }
  0x15   : > { %p1579_p5 = por %p133_p2, %p132_p0  ;;  %p1583_p6 = por %p139_p4, %p138_p3 }
  0x16   : > { %2378 = sst [smem:[#allocation18_spill]] %s1577_s27  ;;  %p1061_p7 = scmp.ge.s32.totalorder %s1462_s21, 1 }
  0x17   : > { %s2379_s28 = scalar_select %p1579_p5, 1, 0 }
  0x18   : > { %s2381_s29 = scalar_select %p1583_p6, 1, 0 }
  0x19   : > { %2380 = sst [smem:[#allocation19_spill]] %s2379_s28  ;;  %p172_p8 = scmp.lt.s32.totalorder %s1462_s21, 3 }
  0x1a   : > { %2382 = sst [smem:[#allocation20_spill]] %s2381_s29  ;;  %p2264_p9 = scmp.eq.s32.totalorder %s1562_s22, 0 }
  0x1b   : > { %p1590_p10 = pnand %p1061_p7, %p172_p8  ;;  %s2384_s2 = sld [smem:[#allocation94_spill]] }
  0x1c   : > { %s2385_s3 = sld [smem:[#allocation95_spill]] }
  0x1d   : > { %s2383_s30 = scalar_select %p1590_p10, 1, 0 }
  0x1e   : > { %p1188_p11 = pneg %p1590_p10 }
  0x20   : > { %p1604_p12 = pnand %p2264_p9, %p1188_p11 }
  0x21   : > { %s185_s8 = sshll.u32 %s2384_s2, 4  ;;  %s186_s8 = int_to_ptr.vmem [resolvable:$true] %s185_s8 }
  0x22   : > { %s196_s11 = sshll.u32 %s2385_s3, 4  ;;  %s1322_s13 = scalar_lea.vmem %s186_s8, 128  ;;  %s197_s11 = int_to_ptr.vmem [resolvable:$true] %s196_s11 }
  0x23   : > { %p1323_p13 = scmp.ne.s32.totalorder %s186_s8, %s1322_s13  ;;  %p1324_p0 = pneg %p1604_p12 }
  0x24   : > { %p1330_p3 = scmp.lt.s32.totalorder %s186_s8, %s186_s8  ;;  %p1331_p4 = scmp.lt.s32.totalorder %s1322_s13, %s1322_s13 }
  0x25   : > { %p1325_p1 = pnand %p1324_p0, %p1323_p13 }
  0x26   : > { %p1332_p7 = por %p1331_p4, %p1330_p3 }
  0x27   : > { %p1326_p2 = pneg %p1325_p1 }
  0x29   : > { %p1333_p8 = pnand %p1332_p7, %p1326_p2 }
  0x2b   : > { %1336 = shalt.err (!%p1333_p8)
}
  0x2c   : > { %s1504_s14 = smov [#allocation3]   ;;  %s1337_s15 = scalar_lea.vmem %s197_s11, 128 }
  0x2d   : > { %1191 = dma.vmem_to_smem (!%p1604_p12), %s186_s8, 128, %s1504_s14, [#allocation5]  }
  0x2e   : > { %p1338_p11 = scmp.ne.s32.totalorder %s197_s11, %s1337_s15  ;;  %p1345_p5 = scmp.lt.s32.totalorder %s197_s11, %s197_s11 }
  0x2f   : > { %p1346_p10 = scmp.lt.s32.totalorder %s1337_s15, %s1337_s15 }
  0x30   : > { %p1340_p9 = pnand %p1338_p11, %p1324_p0 }
  0x31   : > { %p1347_p13 = por %p1346_p10, %p1345_p5 }
  0x32   : > { %p1341_p6 = pneg %p1340_p9 }
  0x34   : > { %p1348_p1 = pnand %p1347_p13, %p1341_p6 }
  0x36   : > { %1351 = shalt.err (!%p1348_p1)
}
  0x37   : > { %s1505_s16 = smov [#allocation6]   ;;  %p2387_p2 = scmp.ne.s32.totalorder %s2383_s30, 0 }
  0x38   : > { %1194 = dma.vmem_to_smem (!%p1604_p12), %s197_s11, 128, %s1505_s16, [#allocation7]  }
  0x39   : > { %225 = sbr.rel (%p2387_p2) target bundleno = 302 (0x12e), region = 36 }
  0x40   : > { %p2388_p3 = scmp.eq.s32.totalorder %s1562_s22, 0 }
  0x42   : > { %1437 = dma.done.wait (%p2388_p3), [#allocation5], 128   ;;  %p2389_p4 = pmov %p2388_p3 }
  0x43   : > { %p2390_p9 = pmov %p2388_p3 }
  0x44   : > { %1439 = vsyncadd (%p2389_p4), [#allocation5], 4294967168 }
  0x45   : > { %1441 = dma.done.wait (%p2390_p9), [#allocation7], 128   ;;  %p2391_p5 = pmov %p2388_p3 }
  0x47   : > { %1443 = vsyncadd (%p2391_p5), [#allocation7], 4294967168 }
  0x48   : > { %235 = sfence }
  0x49   : > { %s2267_s17 = sand.u32 1, %s1454_s19   ;;  %p268_p6 = scmp.lt.s32.totalorder %s1562_s22, 1 }
  0x4a   : > { %s1628_s23 = sshll.u32 %s2267_s17, 5  ;;  %s1631_s26 = sld [smem:[#allocation6]] }
  0x4b   : > { %2392 = sst [smem:[#allocation21_spill]] %s1628_s23  ;;  %s2394_s1 = sld [smem:[#allocation93_spill]] }
  0x4c   : > { %s269_s25 = scalar_select %p268_p6, %s1562_s22, 1 }
  0x4d   : > { %s2396_s5 = sld [smem:[#allocation97_spill]]  ;;  %s2398_s0 = sld [smem:[#allocation92_spill]] }
  0x4e   : > { %s1177_s30 = smul.u32 1536, %s269_s25  ;;  %s1174_s6 = sshll.u32 %s269_s25, 8 }
  0x4f   : > { %s1648_s16 = sld [smem:[#allocation6 + $0x1]]  ;;  %s1650_s17 = sld [smem:[#allocation6 + $0x2]] }
  0x50   : > { %2393 = sst [smem:[#allocation22_spill]] %s1631_s26  ;;  %s1652_s25 = sld [smem:[#allocation6 + $0x3]] }
  0x51   : > { %s1636_s9 = scalar_lea.vmem %s2394_s1, %s1174_s6  ;;  %s1654_s2 = sld [smem:[#allocation6 + $0x4]] }
  0x52   : > { %2395 = sst [smem:[#allocation23_spill]] %s1636_s9  ;;  %s1656_s7 = sld [smem:[#allocation6 + $0x5]] }
  0x53   : > { %s1641_s12 = scalar_lea.vmem %s2396_s5, %s1174_s6  ;;  %s1646_s15 = scalar_lea.vmem %s2398_s0, %s1177_s30 }
  0x54   : > { %2397 = sst [smem:[#allocation24_spill]] %s1641_s12  ;;  %s1658_s8 = sld [smem:[#allocation6 + $0x80]] }
  0x55   : > { %2399 = sst [smem:[#allocation25_spill]] %s1646_s15  ;;  %s1660_s10 = sld [smem:[#allocation6 + $0x81]] }
  0x56   : > { %2400 = sst [smem:[#allocation26_spill]] %s1648_s16  ;;  %s1662_s6 = sld [smem:[#allocation6 + $0x82]] }
  0x57   : > { %2401 = sst [smem:[#allocation27_spill]] %s1650_s17  ;;  %s1664_s11 = sld [smem:[#allocation6 + $0x83]] }
  0x58   : > { %2402 = sst [smem:[#allocation28_spill]] %s1652_s25  ;;  %s1666_s30 = sld [smem:[#allocation6 + $0x84]] }
  0x59   : > { %2403 = sst [smem:[#allocation29_spill]] %s1654_s2  ;;  %s1668_s13 = sld [smem:[#allocation6 + $0x85]] }
  0x5a   : > { %2404 = sst [smem:[#allocation30_spill]] %s1656_s7  ;;  %s1670_s14 = sld [smem:[#allocation6 + $0x100]] }
  0x5b   : > { %2405 = sst [smem:[#allocation31_spill]] %s1658_s8  ;;  %s1672_s0 = sld [smem:[#allocation6 + $0x101]] }
  0x5c   : > { %2406 = sst [smem:[#allocation32_spill]] %s1660_s10  ;;  %s1674_s1 = sld [smem:[#allocation6 + $0x102]] }
  0x5d   : > { %2407 = sst [smem:[#allocation33_spill]] %s1662_s6  ;;  %s1676_s3 = sld [smem:[#allocation6 + $0x103]] }
  0x5e   : > { %2408 = sst [smem:[#allocation34_spill]] %s1664_s11  ;;  %s1678_s5 = sld [smem:[#allocation6 + $0x104]] }
  0x5f   : > { %2409 = sst [smem:[#allocation35_spill]] %s1666_s30  ;;  %s1680_s27 = sld [smem:[#allocation6 + $0x105]] }
  0x60   : > { %2410 = sst [smem:[#allocation36_spill]] %s1668_s13  ;;  %s1684_s24 = sld [smem:[#allocation6 + $0x181]] }
  0x61   : > { %2411 = sst [smem:[#allocation37_spill]] %s1670_s14  ;;  %s1682_s20 = sld [smem:[#allocation6 + $0x180]] }
  0x62   : > { %2412 = sst [smem:[#allocation38_spill]] %s1672_s0  ;;  %s1688_s18 = sld [smem:[#allocation6 + $0x183]] }
  0x63   : > { %2413 = sst [smem:[#allocation39_spill]] %s1674_s1  ;;  %s1686_s29 = sld [smem:[#allocation6 + $0x182]] }
  0x64   : > { %2414 = sst [smem:[#allocation40_spill]] %s1676_s3  ;;  %s1692_s4 = sld [smem:[#allocation6 + $0x185]] }
  0x65   : > { %2415 = sst [smem:[#allocation41_spill]] %s1678_s5  ;;  %s1690_s21 = sld [smem:[#allocation6 + $0x184]] }
  0x66   : > { %2416 = sst [smem:[#allocation42_spill]] %s1680_s27  ;;  %s1694_s28 = sld [smem:[#allocation6 + $0x200]] }
  0x67   : > { %2417 = sst [smem:[#allocation43_spill]] %s1682_s20  ;;  %s1696_s19 = sld [smem:[#allocation6 + $0x201]] }
  0x68   : > { %2418 = sst [smem:[#allocation44_spill]] %s1684_s24  ;;  %s1698_s22 = sld [smem:[#allocation6 + $0x202]] }
  0x69   : > { %2419 = sst [smem:[#allocation45_spill]] %s1686_s29  ;;  %s1700_s12 = sld [smem:[#allocation6 + $0x203]] }
  0x6a   : > { %2420 = sst [smem:[#allocation46_spill]] %s1688_s18  ;;  %s1702_s15 = sld [smem:[#allocation6 + $0x204]] }
  0x6b   : > { %2421 = sst [smem:[#allocation47_spill]] %s1690_s21  ;;  %s1704_s9 = sld [smem:[#allocation6 + $0x205]] }
  0x6c   : > { %2422 = sst [smem:[#allocation48_spill]] %s1692_s4  ;;  %s1706_s23 = sld [smem:[#allocation6 + $0x280]] }
  0x6d   : > { %2423 = sst [smem:[#allocation49_spill]] %s1694_s28  ;;  %s1708_s18 = sld [smem:[#allocation6 + $0x281]] }
  0x6e   : > { %2424 = sst [smem:[#allocation50_spill]] %s1696_s19  ;;  %s1710_s21 = sld [smem:[#allocation6 + $0x282]] }
  0x6f   : > { %2425 = sst [smem:[#allocation51_spill]] %s1698_s22  ;;  %s1712_s28 = sld [smem:[#allocation3]] }
  0x70   : > { %2426 = sst [smem:[#allocation52_spill]] %s1700_s12  ;;  %s1714_s19 = sld [smem:[#allocation3 + $0x1]] }
  0x71   : > { %2427 = sst [smem:[#allocation53_spill]] %s1702_s15  ;;  %s1716_s12 = sld [smem:[#allocation3 + $0x2]] }
  0x72   : > { %2428 = sst [smem:[#allocation54_spill]] %s1704_s9  ;;  %s1718_s15 = sld [smem:[#allocation3 + $0x3]] }
  0x73   : > { %2429 = sst [smem:[#allocation55_spill]] %s1706_s23  ;;  %s1720_s23 = sld [smem:[#allocation3 + $0x4]] }
  0x74   : > { %2430 = sst [smem:[#allocation56_spill]] %s1708_s18  ;;  %s1722_s18 = sld [smem:[#allocation6 + $0x283]] }
  0x75   : > { %2431 = sst [smem:[#allocation57_spill]] %s1710_s21  ;;  %s1726_s9 = sld [smem:[#allocation6 + $0x284]] }
  0x76   : > { %2432 = sst [smem:[#allocation58_spill]] %s1712_s28  ;;  %s1724_s21 = sld [smem:[#allocation3 + $0x5]] }
  0x77   : > { %2433 = sst [smem:[#allocation59_spill]] %s1714_s19  ;;  %s1728_s22 = sld [smem:[#allocation3 + $0x80]] }
  0x78   : > { %2434 = sst [smem:[#allocation60_spill]] %s1716_s12  ;;  %s1730_s4 = sld [smem:[#allocation6 + $0x285]] }
  0x79   : > { %2435 = sst [smem:[#allocation61_spill]] %s1718_s15  ;;  %s1736_s20 = sld [smem:[#allocation3 + $0x82]] }
  0x7a   : > { %2436 = sst [smem:[#allocation62_spill]] %s1720_s23  ;;  %s1732_s29 = sld [smem:[#allocation3 + $0x81]] }
  0x7b   : > { %2437 = sst [smem:[#allocation63_spill]] %s1722_s18  ;;  %s1744_s5 = sld [smem:[#allocation3 + $0x84]] }
  0x7c   : > { %2438 = sst [smem:[#allocation64_spill]] %s1724_s21  ;;  %s1740_s27 = sld [smem:[#allocation3 + $0x83]] }
  0x7d   : > { %2439 = sst [smem:[#allocation65_spill]] %s1726_s9  ;;  %s1752_s26 = sld [smem:[#allocation3 + $0x100]] }
  0x7e   : > { %2440 = sst [smem:[#allocation66_spill]] %s1728_s22  ;;  %s1748_s3 = sld [smem:[#allocation3 + $0x85]] }
  0x7f   : > { %2441 = sst [smem:[#allocation67_spill]] %s1730_s4  ;;  %s1756_s16 = sld [smem:[#allocation3 + $0x101]] }
  0x80   : > { %2442 = sst [smem:[#allocation68_spill]] %s1732_s29  ;;  %s1760_s17 = sld [smem:[#allocation3 + $0x102]] }
  0x81   : > { %2443 = sst [smem:[#allocation69_spill]] %s1736_s20  ;;  %s1764_s15 = sld [smem:[#allocation3 + $0x103]] }
  0x82   : > { %2444 = sst [smem:[#allocation70_spill]] %s1740_s27  ;;  %s1768_s23 = sld [smem:[#allocation3 + $0x104]] }
  0x83   : > { %2445 = sst [smem:[#allocation71_spill]] %s1744_s5  ;;  %s1772_s21 = sld [smem:[#allocation3 + $0x105]] }
  0x84   : > { %2446 = sst [smem:[#allocation72_spill]] %s1748_s3  ;;  %s1776_s22 = sld [smem:[#allocation3 + $0x180]] }
  0x85   : > { %2447 = sst [smem:[#allocation73_spill]] %s1752_s26  ;;  %s1780_s29 = sld [smem:[#allocation3 + $0x181]] }
  0x86   : > { %2448 = sst [smem:[#allocation74_spill]] %s1756_s16  ;;  %s1784_s20 = sld [smem:[#allocation3 + $0x182]] }
  0x87   : > { %2449 = sst [smem:[#allocation75_spill]] %s1760_s17  ;;  %s1788_s27 = sld [smem:[#allocation3 + $0x183]] }
  0x88   : > { %2451 = sst [smem:[#allocation76_spill]] %s1764_s15  ;;  %s1792_s5 = sld [smem:[#allocation3 + $0x184]] }
  0x89   : > { %2453 = sst [smem:[#allocation77_spill]] %s1768_s23  ;;  %s1796_s3 = sld [smem:[#allocation3 + $0x185]] }
  0x8a   : > { %2455 = sst [smem:[#allocation78_spill]] %s1772_s21  ;;  %s1800_s26 = sld [smem:[#allocation3 + $0x200]] }
  0x8b   : > { %2457 = sst [smem:[#allocation79_spill]] %s1776_s22  ;;  %s1804_s16 = sld [smem:[#allocation3 + $0x201]] }
  0x8c   : > { %2459 = sst [smem:[#allocation80_spill]] %s1780_s29  ;;  %s1808_s17 = sld [smem:[#allocation3 + $0x202]] }
  0x8d   : > { %2461 = sst [smem:[#allocation81_spill]] %s1784_s20  ;;  %s1812_s15 = sld [smem:[#allocation3 + $0x203]] }
  0x8e   : > { %2463 = sst [smem:[#allocation82_spill]] %s1788_s27  ;;  %s1816_s23 = sld [smem:[#allocation3 + $0x204]] }
  0x8f   : > { %2465 = sst [smem:[#allocation83_spill]] %s1792_s5  ;;  %s1820_s12 = sld [smem:[#allocation3 + $0x205]] }
  0x90   : > { %2467 = sst [smem:[#allocation84_spill]] %s1796_s3  ;;  %s1828_s6 = sld [smem:[#allocation3 + $0x281]] }
  0x91   : > { %2469 = sst [smem:[#allocation85_spill]] %s1800_s26  ;;  %s1824_s19 = sld [smem:[#allocation3 + $0x280]] }
  0x92   : > { %2471 = sst [smem:[#allocation86_spill]] %s1804_s16  ;;  %s1836_s27 = sld [smem:[#allocation3 + $0x283]] }
  0x93   : > { %2473 = sst [smem:[#allocation87_spill]] %s1808_s17  ;;  %s1832_s11 = sld [smem:[#allocation3 + $0x282]] }
  0x94   : > { %s1840_s9 = sld [smem:[#allocation3 + $0x284]]  ;;  %s1844_s13 = sld [smem:[#allocation3 + $0x285]] }
  0x95   : > { %s1863_s17 = smov 0  }
  0x98   : > { %2484 = sst [smem:[#allocation88_spill]] %s1836_s27 }
  0x9a   : > { %2485 = sst [smem:[#allocation89_spill]] %s1840_s9 }
  0x9b   : > { %2486 = sst [smem:[#allocation90_spill]] %s1844_s13 }
  0x9c LB: >> { %2487 = sst [smem:[#allocation91_spill]] %s1466_s17  ;;  %s1869_s4 = sshll.u32 %s1466_s17, 3  ;;  %v1871_v0 = vmov -10000.0   ;;  %v1873_v1 = vmov 0.0   ;;  %v1875_v2 = vmov -10000.0   ;;  %v1877_v3 = vmov -10000.0   ;;  %s1466_s17 = sphi %s1863_s17, %s396_s17  }
  0x9d   : >> { %v1879_v4 = vmov -10000.0   ;;  %v1881_v5 = vmov -10000.0   ;;  %s1883_s21 = smov 0  }
  0x9e LB: >>> { %s2488_s22 = sld [smem:[#allocation58_spill]]  ;;  %s2489_s24 = sld [smem:[#allocation22_spill]]  ;;  %v1506_v45 = vmov 0   ;;  %s1494_s21 = sphi %s1883_s21, %s403_s21   ;;  %v1490_v5 = vphi %v1881_v5, %v2599_v5   ;;  %v1486_v4 = vphi %v1879_v4, %v2598_v4   ;;  %v1482_v3 = vphi %v1877_v3, %v2597_v3   ;;  %v1478_v2 = vphi %v1875_v2, %v2596_v2   ;;  %v1474_v1 = vphi %v1873_v1, %v2595_v1   ;;  %v1470_v0 = vphi %v1871_v0, %v2594_v0  }
  0x9f   : >>> { %s2490_s28 = sld [smem:[#allocation59_spill]]  ;;  %s2491_s29 = sld [smem:[#allocation26_spill]] }
  0xa0   : >>> { %s2492_s2 = sld [smem:[#allocation23_spill]]  ;;  %s2493_s7 = sld [smem:[#allocation60_spill]] }
  0xa1   : >>> { %s2494_s8 = sld [smem:[#allocation27_spill]]  ;;  %s2495_s10 = sld [smem:[#allocation61_spill]] }
  0xa2   : >>> { %s2496_s1 = sld [smem:[#allocation28_spill]]  ;;  %s2497_s18 = sld [smem:[#allocation62_spill]] }
  0xa3   : >>> { %s2498_s16 = sld [smem:[#allocation29_spill]]  ;;  %s1145_s0 = sshll.u32 %s1494_s21, 5 }
  0xa4   : >>> { %s411_s26 = sadd.s32 %s1145_s0, %s1869_s4  ;;  %s2499_s20 = ssub.f32 %s2488_s22, %s2489_s24  ;;  %v416_v7 = vstv %s2489_s24 }
  0xa5   : >>> { %s2500_s14 = ssub.f32 %s2490_s28, %s2491_s29  ;;  %s2501_s3 = sld [smem:[#allocation64_spill]]  ;;  %v421_v9 = vstv %s2491_s29 }
  0xa6   : >>> { %v414_v6 = vstv %s2499_s20  ;;  %s2502_s25 = sld [smem:[#allocation30_spill]]  ;;  %s412_s5 = scalar_lea.vmem %s2492_s2, %s411_s26 }
  0xa7   : >>> { %v419_v8 = vstv %s2500_s14  ;;  %s2503_s30 = sld [smem:[#allocation66_spill]]  ;;  %s2504_s17 = sld [smem:[#allocation31_spill]]  ;;  %v429_v11 = vstv %s2494_s8  ;;  %v1924_v13 = vld [vmem:[%s412_s5] sm:$0xff] }
  0xa8   : >>> { %s2506_s9 = ssub.f32 %s2493_s7, %s2494_s8  ;;  %v437_v14 = vstv %s2496_s1  ;;  %v415_v17 = vmul.f32 %v414_v6, %v1924_v13  ;;  %v420_v18 = vmul.f32 %v419_v8, %v1924_v13  ;;  %s2513_s26 = sld [smem:[#allocation69_spill]] }
  0xa9   : >>> { %s2507_s27 = ssub.f32 %s2495_s10, %s2496_s1  ;;  %v445_v16 = vstv %s2498_s16  ;;  %s462_s14 = smul.u32 192, %s1494_s21 }
  0xaa   : >>> { %v427_v10 = vstv %s2506_s9  ;;  %s2508_s0 = ssub.f32 %s2497_s18, %s2498_s16  ;;  %v417_v25 = vadd.f32 %v416_v7, %v415_v17  ;;  %s2511_s18 = sld [smem:[#allocation68_spill]]  ;;  %v422_v26 = vadd.f32 %v421_v9, %v420_v18 }
  0xab   : >>> { %v435_v12 = vstv %s2507_s27  ;;  %v428_v19 = vmul.f32 %v427_v10, %v1924_v13  ;;  %s2512_s27 = sld [smem:[#allocation32_spill]]  ;;  %s2514_s9 = sld [smem:[#allocation33_spill]] }
  0xac   : >>> { %v443_v15 = vstv %s2508_s0  ;;  %v436_v20 = vmul.f32 %v435_v12, %v1924_v13  ;;  %s2509_s20 = ssub.f32 %s2501_s3, %s2502_s25  ;;  %v453_v23 = vstv %s2502_s25  ;;  %v418_v33 = vadd.f32 %v1490_v5, %v417_v25  ;;  %s2519_s28 = sld [smem:[#allocation25_spill]] }
  0xad   : >>> { %s2505_s13 = smov %s2504_s17  ;;  %v444_v21 = vmul.f32 %v443_v15, %v1924_v13  ;;  %s2510_s5 = ssub.f32 %s2503_s30, %s2504_s17  ;;  %v430_v27 = vadd.f32 %v429_v11, %v428_v19  ;;  %v423_v34 = vadd.f32 %v1486_v4, %v422_v26 }
  0xae   : >>> { %v451_v22 = vstv %s2509_s20  ;;  %v438_v28 = vadd.f32 %v437_v14, %v436_v20  ;;  %v469_v32 = vstv %s2505_s13  ;;  %s2516_s17 = sld [smem:[#allocation70_spill]]  ;;  %s2517_s30 = sld [smem:[#allocation34_spill]] }
  0xaf   : >>> { %v467_v24 = vstv %s2510_s5  ;;  %v446_v29 = vadd.f32 %v445_v16, %v444_v21  ;;  %v452_v30 = vmul.f32 %v451_v22, %v1924_v13  ;;  %v431_v35 = vadd.f32 %v1482_v3, %v430_v27  ;;  %s463_s2 = sadd.s32 %s1869_s4, %s462_s14  ;;  %s2520_s7 = sld [smem:[#allocation71_spill]] }
  0xb0   : >>> { %v468_v31 = vmul.f32 %v467_v24, %v1924_v13  ;;  %v439_v36 = vadd.f32 %v1478_v2, %v438_v28  ;;  %vm424_vm0 = vcmp.gt.f32.partialorder %v423_v34, %v418_v33  ;;  %s2521_s10 = sld [smem:[#allocation35_spill]]  ;;  %s459_s0 = smul.u32 48, %s1494_s21 }
  0xb1   : >>> { %v447_v37 = vadd.f32 %v1474_v1, %v446_v29  ;;  %v454_v38 = vadd.f32 %v453_v23, %v452_v30  ;;  %s2515_s3 = ssub.f32 %s2511_s18, %s2512_s27  ;;  %v474_v42 = vstv %s2512_s27  ;;  %v425_v44 = vsel %vm424_vm0, %v423_v34, %v418_v33  ;;  %s2525_s14 = sld [smem:[#allocation36_spill]] }
  0xb2   : >>> { %v470_v39 = vadd.f32 %v469_v32, %v468_v31  ;;  %s2518_s22 = ssub.f32 %s2513_s26, %s2514_s9  ;;  %v426_v46 = vsel %vm424_vm0, 1, %v1506_v45  ;;  %vm432_vm1 = vcmp.gt.f32.partialorder %v431_v35, %v425_v44  ;;  %v482_v51 = vstv %s2514_s9  ;;  %s1972_s5 = scalar_lea.vmem %s2519_s28, %s463_s2 }
  0xb3   : >>> { %v472_v40 = vstv %s2515_s3  ;;  %v455_v47 = vadd.f32 %v1470_v0, %v454_v38  ;;  %v433_v52 = vsel %vm432_vm1, %v431_v35, %v425_v44  ;;  %v434_v53 = vsel %vm432_vm1, 2, %v426_v46  ;;  %v465_v9 = vld [vmem:[%s1972_s5] sm:$0xff]  ;;  %s2524_s26 = sld [smem:[#allocation72_spill]]  ;;  %s2526_s3 = sld [smem:[#allocation73_spill]] }
  0xb4   : >>> { %v473_v41 = vmul.f32 %v472_v40, %v1924_v13  ;;  %v480_v43 = vstv %s2518_s22  ;;  %v471_v48 = vadd.f32 %v1490_v5, %v470_v39  ;;  %s2522_s20 = ssub.f32 %s2516_s17, %s2517_s30  ;;  %v490_v55 = vstv %s2517_s30  ;;  %s2527_s17 = sld [smem:[#allocation37_spill]] }
  0xb5   : >>> { %v481_v50 = vmul.f32 %v480_v43, %v1924_v13  ;;  %vm440_vm2 = vcmp.gt.f32.partialorder %v439_v36, %v433_v52  ;;  %s2529_s28 = sld [smem:[#allocation74_spill]]  ;;  %s2530_s2 = sld [smem:[#allocation38_spill]] }
  0xb6   : >>> { %v475_v49 = vadd.f32 %v474_v42, %v473_v41  ;;  %v488_v54 = vstv %s2522_s20  ;;  %v441_v59 = vsel %vm440_vm2, %v439_v36, %v433_v52  ;;  %v442_v60 = vsel %vm440_vm2, 3, %v434_v53  ;;  %s2523_s18 = ssub.f32 %s2520_s7, %s2521_s10  ;;  %s1985_s7 = scalar_lea.vmem [#allocation2], %s459_s0  ;;  %v1148_v41 = vld [vmem:[%s1972_s5 + $0x20] sm:$0xff] }
  0xb7   : >>> { %v483_v57 = vadd.f32 %v482_v51, %v481_v50  ;;  %v489_v58 = vmul.f32 %v488_v54, %v1924_v13  ;;  %v498_v62 = vstv %s2521_s10  ;;  %vm448_vm3 = vcmp.gt.f32.partialorder %v447_v37, %v441_v59  ;;  %s2531_s20 = sld [smem:[#allocation75_spill]]  ;;  %s2534_s8 = sld [smem:[#allocation76_spill]] }
  0xb8   : >>> { %v476_v56 = vadd.f32 %v1486_v4, %v475_v49  ;;  %v496_v61 = vstv %s2523_s18  ;;  %v449_v7 = vsel %vm448_vm3, %v447_v37, %v441_v59  ;;  %v450_v8 = vsel %vm448_vm3, 4, %v442_v60  ;;  %s2532_s18 = sld [smem:[#allocation39_spill]]  ;;  %s2535_s9 = sld [smem:[#allocation40_spill]] }
  0xb9   : >>> { %v484_v63 = vadd.f32 %v1482_v3, %v483_v57  ;;  %v491_v6 = vadd.f32 %v490_v55, %v489_v58  ;;  %vm456_vm5 = vcmp.gt.f32.partialorder %v455_v47, %v449_v7  ;;  %v497_v14 = vmul.f32 %v496_v61, %v1924_v13  ;;  %s2533_s1 = ssub.f32 %s2524_s26, %s2525_s14  ;;  %s2539_s26 = sld [smem:[#allocation41_spill]] }
  0xba   : >>> { %vm477_vm4 = vcmp.gt.f32.partialorder %v476_v56, %v471_v48  ;;  %s2528_s22 = smov %s2527_s17  ;;  %v457_v15 = vsel %vm456_vm5, %v455_v47, %v449_v7  ;;  %v458_v16 = vsel %vm456_vm5, 5, %v450_v8  ;;  %v506_v25 = vstv %s2525_s14  ;;  %s2536_s0 = ssub.f32 %s2526_s3, %s2527_s17 }
  0xbb   : >>> { %v478_v10 = vsel %vm477_vm4, %v476_v56, %v471_v48  ;;  %v479_v11 = vsel %vm477_vm4, 1, %v1506_v45  ;;  %v492_v12 = vadd.f32 %v1478_v2, %v491_v6  ;;  %461 = vst [vmem:[%s1985_s7] sm:$0xff] %v458_v16  ;;  %v1988_v19 = vadd.f32 %v465_v9, %v457_v15   ;;  %s2537_s10 = ssub.f32 %s2529_s28, %s2530_s2  ;;  %s2543_s17 = sld [smem:[#allocation42_spill]] }
  0xbc   : >>> { %vm485_vm6 = vcmp.gt.f32.partialorder %v484_v63, %v478_v10  ;;  %v499_v20 = vadd.f32 %v498_v62, %v497_v14  ;;  %v504_v21 = vstv %s2533_s1  ;;  %v520_v27 = vstv %s2536_s0  ;;  %s2538_s1 = sld [smem:[#allocation77_spill]]  ;;  %s2546_s28 = sld [smem:[#allocation43_spill]] }
  0xbd   : >>> { %v486_v17 = vsel %vm485_vm6, %v484_v63, %v478_v10  ;;  %v487_v18 = vsel %vm485_vm6, 2, %v479_v11  ;;  %v505_v24 = vmul.f32 %v504_v21, %v1924_v13  ;;  %v522_v28 = vstv %s2528_s22  ;;  %s2549_s0 = sld [smem:[#allocation44_spill]]  ;;  %s403_s21 = sadd.s32 1, %s1494_s21  }
  0xbe   : >>> { %vm493_vm7 = vcmp.gt.f32.partialorder %v492_v12, %v486_v17  ;;  %v500_v26 = vadd.f32 %v1474_v1, %v499_v20  ;;  %v525_v29 = vstv %s2537_s10  ;;  %v521_v31 = vmul.f32 %v520_v27, %v1924_v13  ;;  %s2540_s13 = ssub.f32 %s2531_s20, %s2532_s18  ;;  %s2542_s10 = sld [smem:[#allocation78_spill]] }
  0xbf   : >>> { %v494_v22 = vsel %vm493_vm7, %v492_v12, %v486_v17  ;;  %v495_v23 = vsel %vm493_vm7, 3, %v487_v18  ;;  %v507_v30 = vadd.f32 %v506_v25, %v505_v24  ;;  %v526_v32 = vmul.f32 %v525_v29, %v1924_v13  ;;  %s2541_s3 = ssub.f32 %s2534_s8, %s2535_s9  ;;  %s2545_s8 = sld [smem:[#allocation79_spill]] }
  0xc0   : >>> { %v527_v33 = vstv %s2530_s2  ;;  %vm501_vm8 = vcmp.gt.f32.partialorder %v500_v26, %v494_v22  ;;  %v533_v34 = vstv %s2540_s13  ;;  %v535_v35 = vstv %s2532_s18  ;;  %s2548_s20 = sld [smem:[#allocation80_spill]]  ;;  %p400_p10 = scmp.ge.s32.totalorder %s403_s21, 8  }
  0xc1   : >>> { %v541_v36 = vstv %s2541_s3  ;;  %v502_v37 = vsel %vm501_vm8, %v500_v26, %v494_v22  ;;  %v503_v38 = vsel %vm501_vm8, 4, %v495_v23  ;;  %v508_v39 = vadd.f32 %v1470_v0, %v507_v30  ;;  %s2552_s3 = sld [smem:[#allocation45_spill]] }
  0xc2   : >>> { %v523_v40 = vadd.f32 %v522_v28, %v521_v31  ;;  %v528_v42 = vadd.f32 %v527_v33, %v526_v32  ;;  %v534_v43 = vmul.f32 %v533_v34, %v1924_v13  ;;  %v542_v44 = vmul.f32 %v541_v36, %v1924_v13  ;;  %s2544_s13 = ssub.f32 %s2538_s1, %s2539_s26  ;;  %v1151_v28 = vld [vmem:[%s1972_s5 + $0x40] sm:$0xff]  ;;  %s2603_s21 = sld [smem:[#allocation21_spill]] (%p400_p10) }
  0xc3   : >>> { %v543_v46 = vstv %s2535_s9  ;;  %vm509_vm9 = vcmp.gt.f32.partialorder %v508_v39, %v502_v37  ;;  %v551_v49 = vstv %s2539_s26  ;;  %v559_v60 = vstv %s2543_s17  ;;  %s2551_s26 = sld [smem:[#allocation81_spill]] }
  0xc4   : >>> { %v524_v47 = vadd.f32 %v1490_v5, %v523_v40  ;;  %v549_v48 = vstv %s2544_s13  ;;  %v510_v50 = vsel %vm509_vm9, %v508_v39, %v502_v37  ;;  %v511_v51 = vsel %vm509_vm9, 5, %v503_v38  ;;  %s2547_s9 = ssub.f32 %s2542_s10, %s2543_s17  ;;  %s2553_s10 = sld [smem:[#allocation82_spill]] }
  0xc5   : >>> { %v529_v52 = vadd.f32 %v1486_v4, %v528_v42  ;;  %v536_v53 = vadd.f32 %v535_v35, %v534_v43  ;;  %1146 = vst [vmem:[%s1985_s7 + $0x8] sm:$0xff] %v511_v51  ;;  %v2025_v54 = vadd.f32 %v1148_v41, %v510_v50   ;;  %v544_v55 = vadd.f32 %v543_v46, %v542_v44  ;;  %s2550_s1 = ssub.f32 %s2545_s8, %s2546_s28  ;;  %s2554_s13 = sld [smem:[#allocation46_spill]] }
  0xc6   : >>> { %v550_v56 = vmul.f32 %v549_v48, %v1924_v13  ;;  %v557_v57 = vstv %s2547_s9  ;;  %v575_v9 = vstv %s2546_s28  ;;  %s2555_s17 = ssub.f32 %s2548_s20, %s2549_s0  ;;  %v580_v17 = vstv %s2549_s0  ;;  %s2557_s28 = sld [smem:[#allocation83_spill]] }
  0xc7   : >>> { %vm530_vm10 = vcmp.gt.f32.partialorder %v529_v52, %v524_v47  ;;  %v537_v58 = vadd.f32 %v1482_v3, %v536_v53  ;;  %v558_v59 = vmul.f32 %v557_v57, %v1924_v13  ;;  %v545_v63 = vadd.f32 %v1478_v2, %v544_v55  ;;  %s2558_s9 = sld [smem:[#allocation47_spill]]  ;;  %s2560_s20 = sld [smem:[#allocation84_spill]] }
  0xc8   : >>> { %v531_v61 = vsel %vm530_vm10, %v529_v52, %v524_v47  ;;  %v532_v62 = vsel %vm530_vm10, 1, %v1506_v45  ;;  %v552_v6 = vadd.f32 %v551_v49, %v550_v56  ;;  %v573_v8 = vstv %s2550_s1  ;;  %s2561_s0 = sld [smem:[#allocation48_spill]] }
  0xc9   : >>> { %vm538_vm11 = vcmp.gt.f32.partialorder %v537_v58, %v531_v61  ;;  %v560_v7 = vadd.f32 %v559_v60, %v558_v59  ;;  %v574_v14 = vmul.f32 %v573_v8, %v1924_v13  ;;  %v578_v16 = vstv %s2555_s17  ;;  %s2556_s8 = ssub.f32 %s2551_s26, %s2552_s3  ;;  %s2565_s17 = sld [smem:[#allocation86_spill]] }
  0xca   : >>> { %v539_v10 = vsel %vm538_vm11, %v537_v58, %v531_v61  ;;  %v540_v11 = vsel %vm538_vm11, 2, %v532_v62  ;;  %v553_v12 = vadd.f32 %v1474_v1, %v552_v6  ;;  %v579_v22 = vmul.f32 %v578_v16, %v1924_v13 }
  0xcb   : >>> { %vm546_vm12 = vcmp.gt.f32.partialorder %v545_v63, %v539_v10  ;;  %v561_v15 = vadd.f32 %v1470_v0, %v560_v7  ;;  %v576_v21 = vadd.f32 %v575_v9, %v574_v14  ;;  %v586_v23 = vstv %s2556_s8  ;;  %s2559_s1 = ssub.f32 %s2553_s10, %s2554_s13  ;;  %s2564_s10 = sld [smem:[#allocation49_spill]] }
  0xcc   : >>> { %v547_v18 = vsel %vm546_vm12, %v545_v63, %v539_v10  ;;  %v548_v20 = vsel %vm546_vm12, 3, %v540_v11  ;;  %v588_v24 = vstv %s2552_s3  ;;  %v581_v30 = vadd.f32 %v580_v17, %v579_v22  ;;  %s2563_s3 = sld [smem:[#allocation85_spill]]  ;;  %s2566_s8 = sld [smem:[#allocation50_spill]]  ;;  %v1154_v17 = vld [vmem:[%s1972_s5 + $0x60] sm:$0xff] }
  0xcd   : >>> { %vm554_vm13 = vcmp.gt.f32.partialorder %v553_v12, %v547_v18  ;;  %v594_v25 = vstv %s2559_s1  ;;  %v577_v29 = vadd.f32 %v1490_v5, %v576_v21  ;;  %v587_v31 = vmul.f32 %v586_v23, %v1924_v13  ;;  %s2562_s26 = ssub.f32 %s2557_s28, %s2558_s9  ;;  %s2568_s28 = sld [smem:[#allocation87_spill]] }
  0xce   : >>> { %v555_v26 = vsel %vm554_vm13, %v553_v12, %v547_v18  ;;  %v556_v27 = vsel %vm554_vm13, 4, %v548_v20  ;;  %v595_v32 = vmul.f32 %v594_v25, %v1924_v13  ;;  %v596_v33 = vstv %s2554_s13  ;;  %s2567_s13 = ssub.f32 %s2560_s20, %s2561_s0  ;;  %s2569_s1 = sld [smem:[#allocation51_spill]] }
  0xcf   : >>> { %vm562_vm14 = vcmp.gt.f32.partialorder %v561_v15, %v555_v26  ;;  %v582_v36 = vadd.f32 %v1486_v4, %v581_v30  ;;  %v602_v37 = vstv %s2562_s26  ;;  %v589_v39 = vadd.f32 %v588_v24, %v587_v31  ;;  %s2572_s20 = sld [smem:[#allocation52_spill]] }
  0xd0   : >>> { %v563_v34 = vsel %vm562_vm14, %v561_v15, %v555_v26  ;;  %v564_v35 = vsel %vm562_vm14, 5, %v556_v27  ;;  %v597_v40 = vadd.f32 %v596_v33, %v595_v32  ;;  %v603_v41 = vmul.f32 %v602_v37, %v1924_v13 }
  0xd1   : >>> { %1149 = vst [vmem:[%s1985_s7 + $0x10] sm:$0xff] %v564_v35  ;;  %v2065_v38 = vadd.f32 %v1151_v28, %v563_v34   ;;  %vm583_vm15 = vcmp.gt.f32.partialorder %v582_v36, %v577_v29  ;;  %v604_v42 = vstv %s2558_s9  ;;  %v610_v43 = vstv %s2567_s13  ;;  %s2578_s13 = sld [smem:[#allocation55_spill]] }
  0xd2   : >>> { %v612_v44 = vstv %s2561_s0  ;;  %v584_v46 = vsel %vm583_vm15, %v582_v36, %v577_v29  ;;  %v585_v47 = vsel %vm583_vm15, 1, %v1506_v45  ;;  %v590_v48 = vadd.f32 %v1482_v3, %v589_v39  ;;  %s2570_s26 = ssub.f32 %s2563_s3, %s2564_s10  ;;  %s2574_s3 = sld [smem:[#allocation53_spill]] }
  0xd3   : >>> { %v598_v49 = vadd.f32 %v1478_v2, %v597_v40  ;;  %v605_v50 = vadd.f32 %v604_v42, %v603_v41  ;;  %v611_v51 = vmul.f32 %v610_v43, %v1924_v13  ;;  %v628_v53 = vstv %s2564_s10  ;;  %s2571_s9 = ssub.f32 %s2565_s17, %s2566_s8  ;;  %s2576_s17 = sld [smem:[#allocation54_spill]] }
  0xd4   : >>> { %v626_v52 = vstv %s2570_s26  ;;  %vm591_vm0 = vcmp.gt.f32.partialorder %v590_v48, %v584_v46  ;;  %v633_v57 = vstv %s2566_s8  ;;  %s2573_s0 = ssub.f32 %s2568_s28, %s2569_s1  ;;  %v641_v14 = vstv %s2569_s1  ;;  %s2580_s1 = sld [smem:[#allocation56_spill]] }
  0xd5   : >>> { %v627_v55 = vmul.f32 %v626_v52, %v1924_v13  ;;  %v631_v56 = vstv %s2571_s9  ;;  %v592_v58 = vsel %vm591_vm0, %v590_v48, %v584_v46  ;;  %v593_v59 = vsel %vm591_vm0, 2, %v585_v47  ;;  %s2575_s10 = ssub.f32 %s1812_s15, %s2572_s20  ;;  %s2582_s9 = sld [smem:[#allocation57_spill]] }
  0xd6   : >>> { %v606_v60 = vadd.f32 %v1474_v1, %v605_v50  ;;  %v613_v61 = vadd.f32 %v612_v44, %v611_v51  ;;  %vm599_vm1 = vcmp.gt.f32.partialorder %v598_v49, %v592_v58  ;;  %v632_v63 = vmul.f32 %v631_v56, %v1924_v13 }
  0xd7   : >>> { %v629_v62 = vadd.f32 %v628_v53, %v627_v55  ;;  %v639_v6 = vstv %s2573_s0  ;;  %v600_v7 = vsel %vm599_vm1, %v598_v49, %v592_v58  ;;  %v601_v8 = vsel %vm599_vm1, 3, %v593_v59  ;;  %s2581_s26 = ssub.f32 %s1824_s19, %s2578_s13  ;;  %s2584_s0 = sld [smem:[#allocation88_spill]] }
  0xd8   : >>> { %v614_v9 = vadd.f32 %v1470_v0, %v613_v61  ;;  %v640_v10 = vmul.f32 %v639_v6, %v1924_v13  ;;  %vm607_vm2 = vcmp.gt.f32.partialorder %v606_v60, %v600_v7  ;;  %v634_v12 = vadd.f32 %v633_v57, %v632_v63  ;;  %s2577_s8 = ssub.f32 %s1816_s23, %s2574_s3  ;;  %v1157_v57 = vld [vmem:[%s1972_s5 + $0x80] sm:$0xff] }
  0xd9   : >>> { %v630_v11 = vadd.f32 %v1490_v5, %v629_v62  ;;  %v608_v15 = vsel %vm607_vm2, %v606_v60, %v600_v7  ;;  %v609_v16 = vsel %vm607_vm2, 4, %v601_v8  ;;  %v647_v20 = vstv %s2575_s10  ;;  %s2579_s28 = ssub.f32 %s1820_s12, %s2576_s17 }
  0xda   : >>> { %v642_v18 = vadd.f32 %v641_v14, %v640_v10  ;;  %vm615_vm3 = vcmp.gt.f32.partialorder %v614_v9, %v608_v15  ;;  %v635_v21 = vadd.f32 %v1486_v4, %v634_v12  ;;  %v648_v22 = vmul.f32 %v647_v20, %v1924_v13 }
  0xdb   : >>> { %v649_v23 = vstv %s2572_s20  ;;  %v616_v24 = vsel %vm615_vm3, %v614_v9, %v608_v15  ;;  %v617_v25 = vsel %vm615_vm3, 5, %v609_v16  ;;  %v655_v27 = vstv %s2577_s8  ;;  %s2583_s20 = ssub.f32 %s1828_s6, %s2580_s1  ;;  %s2588_s8 = sld [smem:[#allocation65_spill]] }
  0xdc   : >>> { %v643_v26 = vadd.f32 %v1482_v3, %v642_v18  ;;  %1152 = vst [vmem:[%s1985_s7 + $0x18] sm:$0xff] %v617_v25  ;;  %v2107_v28 = vadd.f32 %v1154_v17, %v616_v24   ;;  %vm636_vm4 = vcmp.gt.f32.partialorder %v635_v21, %v630_v11  ;;  %v650_v29 = vadd.f32 %v649_v23, %v648_v22  ;;  %s2586_s10 = ssub.f32 %s1832_s11, %s2582_s9 }
  0xdd   : >>> { %v656_v30 = vmul.f32 %v655_v27, %v1924_v13  ;;  %v637_v31 = vsel %vm636_vm4, %v635_v21, %v630_v11  ;;  %v638_v32 = vsel %vm636_vm4, 1, %v1506_v45  ;;  %v657_v33 = vstv %s2574_s3  ;;  %s2585_s3 = sld [smem:[#allocation63_spill]] }
  0xde   : >>> { %v663_v34 = vstv %s2579_s28  ;;  %vm644_vm5 = vcmp.gt.f32.partialorder %v643_v26, %v637_v31  ;;  %v651_v35 = vadd.f32 %v1478_v2, %v650_v29  ;;  %v665_v41 = vstv %s2576_s17  ;;  %s2587_s17 = sld [smem:[#allocation89_spill]]  ;;  %s2590_s28 = sld [smem:[#allocation67_spill]] }
  0xdf   : >>> { %v658_v36 = vadd.f32 %v657_v33, %v656_v30  ;;  %v664_v37 = vmul.f32 %v663_v34, %v1924_v13  ;;  %v645_v39 = vsel %vm644_vm5, %v643_v26, %v637_v31  ;;  %v646_v40 = vsel %vm644_vm5, 2, %v638_v32  ;;  %v1160_v33 = vld [vmem:[%s1972_s5 + $0xa0] sm:$0xff]  ;;  %s2600_s5 = sld [smem:[#allocation88_spill]] (%p400_p10) }
  0xe0   : >>> { %v679_v42 = vstv %s2581_s26  ;;  %vm652_vm6 = vcmp.gt.f32.partialorder %v651_v35, %v645_v39  ;;  %v681_v49 = vstv %s2578_s13  ;;  %v684_v50 = vstv %s2583_s20  ;;  %s2589_s13 = sld [smem:[#allocation90_spill]] }
  0xe1   : >>> { %v659_v43 = vadd.f32 %v1474_v1, %v658_v36  ;;  %v666_v44 = vadd.f32 %v665_v41, %v664_v37  ;;  %v680_v46 = vmul.f32 %v679_v42, %v1924_v13  ;;  %v653_v47 = vsel %vm652_vm6, %v651_v35, %v645_v39 }
  0xe2   : >>> { %v654_v48 = vsel %vm652_vm6, 3, %v646_v40  ;;  %v685_v53 = vmul.f32 %v684_v50, %v1924_v13  ;;  %v686_v58 = vstv %s2580_s1  ;;  %v692_v59 = vstv %s2586_s10 }
  0xe3   : >>> { %vm660_vm7 = vcmp.gt.f32.partialorder %v659_v43, %v653_v47  ;;  %v667_v51 = vadd.f32 %v1470_v0, %v666_v44  ;;  %v682_v52 = vadd.f32 %v681_v49, %v680_v46  ;;  %v693_v62 = vmul.f32 %v692_v59, %v1924_v13  ;;  %s2591_s26 = ssub.f32 %s2584_s0, %s2585_s3  ;;  %s2604_s0 = sld [smem:[#allocation24_spill]] (%p400_p10) }
  0xe4   : >>> { %v661_v55 = vsel %vm660_vm7, %v659_v43, %v653_v47  ;;  %v662_v56 = vsel %vm660_vm7, 4, %v654_v48  ;;  %v687_v61 = vadd.f32 %v686_v58, %v685_v53  ;;  %v694_v7 = vstv %s2582_s9  ;;  %s2592_s1 = ssub.f32 %s2587_s17, %s2588_s8  ;;  %s2602_s9 = sld [smem:[#allocation90_spill]] (%p400_p10) }
  0xe5   : >>> { %vm668_vm8 = vcmp.gt.f32.partialorder %v667_v51, %v661_v55  ;;  %v683_v60 = vadd.f32 %v1490_v5, %v682_v52  ;;  %v700_v8 = vstv %s2591_s26  ;;  %v695_v11 = vadd.f32 %v694_v7, %v693_v62 }
  0xe6   : >>> { %v669_v63 = vsel %vm668_vm8, %v667_v51, %v661_v55  ;;  %v670_v6 = vsel %vm668_vm8, 5, %v662_v56  ;;  %v688_v10 = vadd.f32 %v1486_v4, %v687_v61  ;;  %v701_v12 = vmul.f32 %v700_v8, %v1924_v13  ;;  %s2593_s20 = ssub.f32 %s2589_s13, %s2590_s28 }
  0xe7   : >>> { %1155 = vst [vmem:[%s1985_s7 + $0x20] sm:$0xff] %v670_v6  ;;  %v678_v9 = vadd.f32 %v1157_v57, %v669_v63   ;;  %v702_v14 = vstv %s2585_s3  ;;  %v708_v15 = vstv %s2592_s1  ;;  %v710_v5 = vstv %s2588_s8  ;;  %s2605_s3 = scalar_lea.vmem (%p400_p10), [#allocation8], %s2603_s21  ;;  %s2195_s8 = smov (%p400_p10), 0  }
  0xe8   : >>> { %v716_v16 = vstv %s2593_s20  ;;  %vm689_vm9 = vcmp.gt.f32.partialorder %v688_v10, %v683_v60  ;;  %v696_v17 = vadd.f32 %v1482_v3, %v695_v11  ;;  %v703_v18 = vadd.f32 %v702_v14, %v701_v12  ;;  %s759_s10 = scalar_lea.vmem (%p400_p10), %s2605_s3, %s1869_s4 [#allocation8] }
  0xe9   : >>> { %v709_v20 = vmul.f32 %v708_v15, %v1924_v13  ;;  %v690_v21 = vsel %vm689_vm9, %v688_v10, %v683_v60  ;;  %v691_v22 = vsel %vm689_vm9, 1, %v1506_v45  ;;  %v717_v4 = vmul.f32 %v716_v16, %v1924_v13  ;;  %s935_s17 = scalar_lea.vmem (%p400_p10), %s2604_s0, %s1869_s4 }
  0xea   : >>> { %v718_v23 = vstv %s2590_s28  ;;  %vm697_vm10 = vcmp.gt.f32.partialorder %v696_v17, %v690_v21  ;;  %v704_v24 = vadd.f32 %v1478_v2, %v703_v18  ;;  %v2596_v2 = vmov %v2107_v28 }
  0xeb   : >>> { %v711_v25 = vadd.f32 %v710_v5, %v709_v20  ;;  %v698_v26 = vsel %vm697_vm10, %v696_v17, %v690_v21  ;;  %v699_v27 = vsel %vm697_vm10, 2, %v691_v22  ;;  %v719_v29 = vadd.f32 %v718_v23, %v717_v4 }
  0xec   : >>> { %vm705_vm11 = vcmp.gt.f32.partialorder %v704_v24, %v698_v26  ;;  %v2598_v4 = vmov %v2025_v54  ;;  %v2599_v5 = vmov %v1988_v19  ;;  %v732_v37 = vstv (%p400_p10), %s1824_s19 }
  0xed   : >>> { %v712_v3 = vadd.f32 %v1474_v1, %v711_v25  ;;  %v706_v30 = vsel %vm705_vm11, %v704_v24, %v698_v26  ;;  %v707_v31 = vsel %vm705_vm11, 3, %v699_v27  ;;  %v720_v32 = vadd.f32 %v1470_v0, %v719_v29 }
  0xee   : >>> { %v2595_v1 = vmov %v678_v9  ;;  %v734_v39 = vstv (%p400_p10), %s1828_s6  ;;  %v739_v40 = vstv (%p400_p10), %s1832_s11  ;;  %v744_v41 = vstv (%p400_p10), %s2600_s5 }
  0xef   : >>> { %vm713_vm12 = vcmp.gt.f32.partialorder %v712_v3, %v706_v30  ;;  %402 = sbr.rel (!%p400_p10) target bundleno = 158 (0x9e), region = 138  ;;  %v733_v42 = vadd.f32 (%p400_p10), %v732_v37, %v1988_v19  ;;  %v735_v43 = vadd.f32 (%p400_p10), %v734_v39, %v2025_v54  ;;  %v740_v44 = vadd.f32 (%p400_p10), %v739_v40, %v2065_v38 }
  0xf0   : >>> { %v714_v45 = vsel %vm713_vm12, %v712_v3, %v706_v30  ;;  %v715_v13 = vsel %vm713_vm12, 4, %v707_v31  ;;  %v2597_v3 = vmov %v2065_v38  ;;  %v754_v2 = vstv (%p400_p10), %s2602_s9 }
  0xf1   : >>> { %vm721_vm13 = vcmp.gt.f32.partialorder %v720_v32, %v714_v45  ;;  %vm736_vm14 = vcmp.gt.f32.partialorder (%p400_p10), %v735_v43, %v733_v42  ;;  %v1507_v47 = vmov (%p400_p10), 0  }
  0xf2   : >>> { %v722_v34 = vsel %vm721_vm13, %v720_v32, %v714_v45  ;;  %v723_v35 = vsel %vm721_vm13, 5, %v715_v13  ;;  %v737_v1 = vsel (%p400_p10), %vm736_vm14, %v735_v43, %v733_v42  ;;  %v738_v48 = vsel (%p400_p10), %vm736_vm14, 1, %v1507_v47 }
  0xf3   : >>> { %1158 = vst [vmem:[%s1985_s7 + $0x28] sm:$0xff] %v723_v35  ;;  %v731_v36 = vadd.f32 %v1160_v33, %v722_v34   ;;  %s2601_s7 = sld [smem:[#allocation89_spill]] (%p400_p10)  ;;  %vm741_vm15 = vcmp.gt.f32.partialorder (%p400_p10), %v740_v44, %v737_v1 }
  0xf4   : >> { %v742_v50 = vsel (%p400_p10), %vm741_vm15, %v740_v44, %v737_v1  ;;  %v743_v19 = vsel (%p400_p10), %vm741_vm15, 2, %v738_v48 }
  0xf5   : >>> { %v2594_v0 = vmov %v731_v36  ;;  %v755_v54 = vadd.f32 (%p400_p10), %v754_v2, %v731_v36 }
  0xf6   : >> { %v745_v0 = vadd.f32 %v744_v41, %v2107_v28 }
  0xf8   : >> { %vm746_vm0 = vcmp.gt.f32.partialorder %v745_v0, %v742_v50 }
  0xf9   : >> { %v749_v46 = vstv %s2601_s7  ;;  %v747_v51 = vsel %vm746_vm0, %v745_v0, %v742_v50  ;;  %v748_v38 = vsel %vm746_vm0, 3, %v743_v19 }
  0xfa   : >> { %v750_v49 = vadd.f32 %v749_v46, %v678_v9 }
  0xfc   : >> { %vm751_vm1 = vcmp.gt.f32.partialorder %v750_v49, %v747_v51 }
  0xfd   : >> { %v752_v52 = vsel %vm751_vm1, %v750_v49, %v747_v51  ;;  %v753_v53 = vsel %vm751_vm1, 4, %v748_v38 }
  0xfe   : >> { %vm756_vm2 = vcmp.gt.f32.partialorder %v755_v54, %v752_v52 }
  0xff   : >> { %v757_v28 = vsel %vm756_vm2, %v755_v54, %v752_v52  ;;  %v758_v55 = vsel %vm756_vm2, 5, %v753_v53  }
 0x100   : >> { %760 = vst [vmem:[%s759_s10] sm:$0xff] %v757_v28  ;;  %1162 = vst [vmem:[%s935_s17 + $0xe0] sm:$0xff] %v758_v55  ;;  %v1496_v56 = vmov %v758_v55  }
 0x101 LB: >>> { %s771_s13 = ssub.s32 7, %s1502_s8  ;;  %s800_s28 = ssub.s32 6, %s1502_s8  ;;  %vm775_vm3 = vcmp.eq.s32.totalorder %v1498_v56, 1  ;;  %vm780_vm4 = vcmp.eq.s32.totalorder %v1498_v56, 2  ;;  %vm785_vm5 = vcmp.eq.s32.totalorder %v1498_v56, 3  ;;  %vm790_vm6 = vcmp.eq.s32.totalorder %v1498_v56, 4  ;;  %s1502_s8 = sphi %s2195_s8, %s769_s8   ;;  %v1498_v56 = vphi %v1496_v56, %v799_v56  }
 0x102   : >>> { %s772_s26 = smul.u32 48, %s771_s13  ;;  %s1168_s1 = sshll.u32 %s800_s28, 5  ;;  %vm795_vm7 = vcmp.eq.s32.totalorder %v1498_v56, 5 }
 0x103   : >>> { %s2606_s20 = sld [smem:[#allocation24_spill]]  ;;  %s802_s7 = sadd.s32 %s1168_s1, %s1869_s4 }
 0x104   : >>> { %s773_s5 = scalar_lea.vmem [#allocation2], %s772_s26  ;;  %s769_s8 = sadd.s32 1, %s1502_s8  }
 0x105   : >>> { %v774_v57 = vld [vmem:[%s773_s5] sm:$0xff]  ;;  %v1163_v58 = vld [vmem:[%s773_s5 + $0x8] sm:$0xff]  ;;  %v1164_v59 = vld [vmem:[%s773_s5 + $0x10] sm:$0xff]  ;;  %p766_p12 = scmp.ge.s32.totalorder %s769_s8, 7  }
 0x106   : >>> { %v779_v60 = vsel %vm775_vm3, %v1163_v58, %v774_v57  ;;  %v1165_v61 = vld [vmem:[%s773_s5 + $0x18] sm:$0xff]  ;;  %v1166_v62 = vld [vmem:[%s773_s5 + $0x20] sm:$0xff]  ;;  %v1167_v6 = vld [vmem:[%s773_s5 + $0x28] sm:$0xff]  ;;  %s2607_s21 = sld [smem:[#allocation91_spill]] (%p766_p12) }
 0x107   : >>> { %v784_v63 = vsel %vm780_vm4, %v1164_v59, %v779_v60  ;;  %768 = sbr.rel (!%p766_p12) target bundleno = 257 (0x101), region = 149 }
 0x108   : >>> { %v789_v7 = vsel %vm785_vm5, %v1165_v61, %v784_v63 }
 0x109   : >>> { %s803_s9 = scalar_lea.vmem %s2606_s20, %s802_s7  ;;  %v794_v8 = vsel %vm790_vm6, %v1166_v62, %v789_v7 }
 0x10a   : >>> { %v799_v56 = vsel %vm795_vm7, %v1167_v6, %v794_v8  }
 0x10b   : >>> { %804 = vst [vmem:[%s803_s9] sm:$0xff] %v799_v56 }
 0x10c   : >> { %s396_s17 = sadd.s32 (%p766_p12), 1, %s2607_s21  }
 0x10d   : >> { %p393_p0 = scmp.ge.s32.totalorder (%p766_p12), %s396_s17, 4  }
 0x10e   : > { %s2608_s0 = sld [smem:[#allocation16_spill]] (%p393_p0)  ;;  %s2609_s3 = sld [smem:[#allocation21_spill]] (%p393_p0) }
 0x10f   : > { %395 = sbr.rel (!%p393_p0) target bundleno = 156 (0x9c), region = 160  ;;  %s2610_s10 = sld [smem:[#allocation13_spill]] (%p393_p0) }
 0x110   : > { %s2611_s13 = sld [smem:[#allocation19_spill]] (%p393_p0)  ;;  %s2612_s20 = sld [smem:[#allocation96_spill]] (%p393_p0) }
 0x111   : > { %s1508_s23 = smov (%p393_p0), [#allocation8]  }
 0x112   : > { %s1356_s12 = sshll.u32 (%p393_p0), %s1508_s23, 4  ;;  %s1357_s12 = int_to_ptr.vmem [resolvable:$false] %s1356_s12 }
 0x113   : > { %s1358_s15 = scalar_lea.vmem (%p393_p0), %s1357_s12, 1024 }
 0x114   : > { %s1176_s28 = sshll.u32 (%p393_p0), %s2608_s0, 9  ;;  %s2614_s9 = scalar_lea.vmem (%p393_p0), [#allocation8], %s2609_s3 }
 0x115   : > { %s824_s8 = sshll.u32 (%p393_p0), %s2614_s9, 4  ;;  %s2615_s4 = sand.u32 (%p393_p0), 1, %s2610_s10   ;;  %s2213_s8 = int_to_ptr.vmem [resolvable:$true] %s824_s8 }
 0x116   : > { %s2613_s5 = smov %s2612_s20  ;;  %s2209_s7 = scalar_lea.hbm %s2612_s20, %s1176_s28 }
 0x117   : > { %s2217_s17 = scalar_lea.sflag [#allocation4], %s2615_s4  ;;  %s1352_s19 = scalar_lea.vmem %s2213_s8, 512 }
 0x118   : > { %p1353_p7 = scmp.ne.s32.totalorder %s2213_s8, %s1352_s19  ;;  %p2616_p8 = scmp.ne.s32.totalorder %s2611_s13, 0 }
 0x119   : > { %p1359_p1 = scmp.lt.s32.totalorder %s2213_s8, %s1357_s12  ;;  %p1360_p2 = scmp.lt.s32.totalorder %s1358_s15, %s1352_s19 }
 0x11a   : > { %p1354_p11 = pnand %p1353_p7, %p2616_p8 }
 0x11b   : > { %p1361_p3 = por %p1360_p2, %p1359_p1 }
 0x11c   : > { %p1355_p13 = pneg %p1354_p11 }
 0x11e   : > { %p1362_p4 = pnand %p1361_p3, %p1355_p13 }
 0x120   : > { %1365 = shalt.err (!%p1362_p4)
}
 0x121   : > { %s1366_s16 = scalar_lea.hbm %s2209_s7, 512  ;;  %s1370_s11 = scalar_lea.hbm %s2613_s5, 1024 }
 0x122   : > { %p1367_p9 = scmp.ne.s32.totalorder %s2209_s7, %s1366_s16  ;;  %p1371_p10 = scmp.lt.u32.totalorder %s2209_s7, %s2613_s5 }
 0x123   : > { %p1372_p12 = scmp.lt.u32.totalorder %s1370_s11, %s1366_s16  ;;  %p1374_p7 = scmp.lt.u32.totalorder %s1366_s16, %s2209_s7 }
 0x124   : > { %p1368_p5 = pnand %p1367_p9, %p2616_p8 }
 0x125   : > { %p1373_p0 = por %p1372_p12, %p1371_p10 }
 0x126   : > { %p1369_p6 = pneg %p1368_p5 }
 0x127   : > { %p1375_p11 = por %p1374_p7, %p1373_p0 }
 0x129   : > { %p1376_p13 = pnand %p1375_p11, %p1369_p6 }
 0x12b   : > { %1379 = shalt.err (!%p1376_p13)
}
 0x12c   : > { %s1509_s27 = smov 128   ;;  %s1510_s30 = smov 8  }
 0x12d   : > { %1186 = dma.vmem_to_hbm [thread:$0]  (%p2616_p8), %s2213_s8, 512, %s2209_s7, %s2217_s17, %s1509_s27, %s1509_s27, %s1510_s30  }
 0x12e PF: > { %s2617_s14 = sld [smem:[#allocation15_spill]]  ;;  %s2618_s22 = sld [smem:[#allocation12_spill]] }
 0x12f   : > { %s2619_s2 = sld [smem:[#allocation20_spill]] }
 0x134   : > { %p1203_p1 = scmp.ge.s32.totalorder %s2617_s14, 2  ;;  %s842_s18 = sand.u32 1, %s2618_s22  }
 0x135   : > { %p2620_p2 = scmp.ne.s32.totalorder %s2619_s2, 0  ;;  %s843_s21 = scalar_lea.sflag [#allocation4], %s842_s18 }
 0x137   : > { %p1196_p3 = pnand %p1203_p1, %p2620_p2 }
 0x139   : > { %1445 = dma.done.wait (!%p1196_p3), %s843_s21, 512  }
 0x13a   : > { %1447 = vsyncadd (!%p1196_p3), %s843_s21, 4294966784  ;;  %s2621_s21 = sld [smem:[#allocation17_spill]]  ;;  %s2622_s18 = sld [smem:[#allocation13_spill]] }
 0x13b   : > { %s2623_s19 = sld [smem:[#allocation14_spill]]  ;;  %s2624_s20 = sld [smem:[#allocation18_spill]] }
 0x140   : > { %p18_p4 = scmp.ge.s32.totalorder %s2621_s21, 4  }
 0x142   :  { %20 = sbr.rel (!%p18_p4) target bundleno = 12 (0xc), region = 171 }
 0x149   :  { %856 = vsyncpa [#allocation4], 1 }
 0x14a   :  { %858 = vsyncpa [#allocation4 + $0x1], 1 }
 0x14b   :  { %859 = vsyncpa [#allocation5], 1 }
 0x14c   :  { %861 = vsyncpa [#allocation5 + $0x1], 1 }
 0x14d   :  { %862 = vsyncpa [#allocation7], 1 }

</bundles_post_ra>
